<compile_context>
chip_gen: v7x
topology: tpu7x:2x2x1
jax: 0.10.0
libtpu: 0.0.40
codegen_flags: <defaults>
</compile_context>

<pallas_src>
import functools

import jax
import jax.numpy as jnp
from jax.experimental import pallas as pl
from jax.experimental.pallas import tpu as pltpu

# ---- model hyperparameters (from the PyTorch script) ------------------------
HIDDEN_SIZE = 50
INPUT_SIZE = 2
NUM_CLASSES = 2
NUM_LAYERS = 1
SEQ_LENGTH = 8
BATCH = 2

HP = 128   # lane-aligned (padded) hidden size per gate
BP = 8     # sublane-aligned (padded) batch


def lstm_kernel(x_ref, ihb_ref, w_hh_ref, hc0_ref, fc_w_ref,
                slab_ref, xproj_ref, *, T, I, Bp, Hp):
    """Full LSTM recurrence + final FC in one kernel invocation.

    x_ref:     (T*Bp, I)      time-major, batch-padded input (flattened)
    ihb_ref:   (I+2, 4*Hp)    rows [0:I) = W_ih^T (gate-padded),
                              row I     = b_ih + b_hh (gate-padded),
                              row I+1   = fc bias in lanes [0:C), rest zero
    w_hh_ref:  (Hp, 4*Hp)     gate-padded transposed hidden->gates weight
    hc0_ref:   (2*Bp, Hp)     rows [0:Bp) = h0 (padded), rows [Bp:2Bp) = c0
    fc_w_ref:  (Hp, Hp)       padded transposed FC weight (extra rows/cols 0)
    slab_ref:  (Bp, 3*Hp)     output: [h | c | fc_out], each a 128-lane block
    xproj_ref: (T*Bp, 4*Hp)   VMEM scratch for the hoisted input projection
    """
    # --- hoisted input projection on the VPU (K = I = 2: broadcast FMAs) ----
    xp = x_ref[:, 0:1] * ihb_ref[0:1, :]
    for k in range(1, I):
        xp = xp + x_ref[:, k:k + 1] * ihb_ref[k:k + 1, :]
    xproj_ref[...] = xp + ihb_ref[I:I + 1, :]                 # (T*Bp, 4*Hp)

    h = hc0_ref[0:Bp, :]                                      # (Bp, Hp)
    c = hc0_ref[Bp:2 * Bp, :]                                 # (Bp, Hp)

    def sigmoid1(v):
        # Exact sigmoid via tanh: one EUP push instead of two.
        return 0.5 * (1.0 + jnp.tanh(0.5 * v))

    # --- fully unrolled recurrence: one matmul per step on the serial path --
    for t in range(T):
        gates = (xproj_ref[t * Bp:(t + 1) * Bp, :]
                 + jnp.dot(h, w_hh_ref[...],
                           preferred_element_type=jnp.float32))   # (Bp, 4*Hp)
        # Gate slices are 128-lane aligned -> zero-cost views.
        i_g = sigmoid1(gates[:, 0 * Hp:1 * Hp])
        f_g = sigmoid1(gates[:, 1 * Hp:2 * Hp])
        g_g = jnp.tanh(gates[:, 2 * Hp:3 * Hp])
        o_g = sigmoid1(gates[:, 3 * Hp:4 * Hp])
        c = f_g * c + i_g * g_g
        h = o_g * jnp.tanh(c)

    # --- single lane-dense output slab: [h | c | fc_out] ---------------------
    slab_ref[:, 0:Hp] = h
    slab_ref[:, Hp:2 * Hp] = c
    fc = (jnp.dot(h, fc_w_ref[...], preferred_element_type=jnp.float32)
          + ihb_ref[I + 1:I + 2, 0:Hp])                       # (Bp, Hp)
    slab_ref[:, 2 * Hp:3 * Hp] = fc


def prepare_params(params):
    """One-time packing of constant weights into padded TPU-friendly layouts.

    Called once at setup (outside the per-call jit path)."""
    H, I, C, Hp = HIDDEN_SIZE, INPUT_SIZE, NUM_CLASSES, HP
    f32 = jnp.float32

    def pad_gate_cols(w_t):
        # w_t: (rows, 4H) -> (rows, 4*Hp), each gate block zero-padded to Hp.
        rows = w_t.shape[0]
        w3 = w_t.reshape(rows, 4, H)
        w3 = jnp.pad(w3, ((0, 0), (0, 0), (0, Hp - H)))
        return w3.reshape(rows, 4 * Hp)

    w_ih_p = pad_gate_cols(params["w_ih"].astype(f32).T)            # (I, 4*Hp)
    w_hh_p = jnp.pad(pad_gate_cols(params["w_hh"].astype(f32).T),
                     ((0, Hp - H), (0, 0)))                         # (Hp, 4*Hp)

    b = (params["b_ih"] + params["b_hh"]).astype(f32)
    b_p = jnp.pad(b.reshape(4, H), ((0, 0), (0, Hp - H))).reshape(1, 4 * Hp)

    fc_b_p = jnp.zeros((1, 4 * Hp), f32).at[0, :C].set(
        params["fc_b"].astype(f32))

    ihb = jnp.concatenate([w_ih_p, b_p, fc_b_p], axis=0)            # (I+2, 4*Hp)

    fc_w_p = jnp.zeros((Hp, Hp), f32).at[:H, :C].set(
        params["fc_w"].astype(f32).T)                               # (Hp, Hp)

    return {"ihb": ihb, "w_hh": w_hh_p, "fc_w": fc_w_p}


@jax.jit
def lstm_forward(x, h_in, c_in, packed):
    """x: (B, T, I) batch_first; h_in/c_in: (num_layers=1, B, H).

    `packed` is the output of prepare_params().  Returns
    (out (B,C), h_out (B,H), c_out (1,B,H)) exactly like the PyTorch forward.
    """
    B, T, I = x.shape
    H, C = HIDDEN_SIZE, NUM_CLASSES
    Hp, Bp = HP, BP
    f32 = jnp.float32

    # Per-call activation packing only (weights are pre-padded constants).
    x_tm = jnp.zeros((T, Bp, I), f32).at[:, :B, :].set(
        jnp.swapaxes(x.astype(f32), 0, 1))
    x_flat = x_tm.reshape(T * Bp, I)                                # (T*Bp, I)

    hc0 = jnp.zeros((2 * Bp, Hp), f32)
    hc0 = hc0.at[:B, :H].set(h_in[0].astype(f32))
    hc0 = hc0.at[Bp:Bp + B, :H].set(c_in[0].astype(f32))

    vmem = pl.BlockSpec(memory_space=pltpu.MemorySpace.VMEM)
    kernel = functools.partial(lstm_kernel, T=T, I=I, Bp=Bp, Hp=Hp)

    slab = pl.pallas_call(
        kernel,
        out_shape=jax.ShapeDtypeStruct((Bp, 3 * Hp), jnp.float32),
        in_specs=[vmem] * 5,
        out_specs=vmem,
        scratch_shapes=[pltpu.VMEM((T * Bp, 4 * Hp), jnp.float32)],
    )(x_flat, packed["ihb"], packed["w_hh"], hc0, packed["fc_w"])

    h_out = slab[:B, 0:H]
    c_out = slab[:B, Hp:Hp + H][None]
    out = slab[:B, 2 * Hp:2 * Hp + C]
    return out, h_out, c_out


def lstm_reference(x, h_in, c_in, params):
    """Pure-JAX reference implementing the same math (for verification)."""
    H = params["w_hh"].shape[1]
    h = h_in[0]
    c = c_in[0]
    for t in range(x.shape[1]):
        x_t = x[:, t, :]
        gates = (x_t @ params["w_ih"].T + params["b_ih"]
                 + h @ params["w_hh"].T + params["b_hh"])
        i = jax.nn.sigmoid(gates[:, 0 * H:1 * H])
        f = jax.nn.sigmoid(gates[:, 1 * H:2 * H])
        g = jnp.tanh(gates[:, 2 * H:3 * H])
        o = jax.nn.sigmoid(gates[:, 3 * H:4 * H])
        c = f * c + i * g
        h = o * jnp.tanh(c)
    out = h @ params["fc_w"].T + params["fc_b"]
    return out, h, c[None]


def init_params(key):
    """Deterministic parameter init matching nn.LSTM / nn.Linear shapes."""
    k = jax.random.split(key, 6)
    H, I, C = HIDDEN_SIZE, INPUT_SIZE, NUM_CLASSES
    bound = 1.0 / jnp.sqrt(jnp.float32(H))
    u = lambda kk, shape: jax.random.uniform(kk, shape, jnp.float32,
                                             -bound, bound)
    return {
        "w_ih": u(k[0], (4 * H, I)),
        "w_hh": u(k[1], (4 * H, H)),
        "b_ih": u(k[2], (4 * H,)),
        "b_hh": u(k[3], (4 * H,)),
        "fc_w": u(k[4], (C, H)),
        "fc_b": u(k[5], (C,)),
    }


if __name__ == "__main__":
    key = jax.random.PRNGKey(0)
    k_param, k_x = jax.random.split(key)

    params = init_params(k_param)
    packed = prepare_params(params)          # one-time constant packing
    jax.block_until_ready(packed)

    x = jax.random.normal(k_x, (BATCH, SEQ_LENGTH, INPUT_SIZE), jnp.float32)
    h_in = jnp.zeros((NUM_LAYERS, BATCH, HIDDEN_SIZE), jnp.float32)
    c_in = jnp.zeros((NUM_LAYERS, BATCH, HIDDEN_SIZE), jnp.float32)

    out, h_out, c_out = lstm_forward(x, h_in, c_in, packed)
    jax.block_until_ready((out, h_out, c_out))

    out_r, h_r, c_r = lstm_reference(x, h_in, c_in, params)
    assert out.shape == (BATCH, NUM_CLASSES)
    assert h_out.shape == (BATCH, HIDDEN_SIZE)
    assert c_out.shape == (NUM_LAYERS, BATCH, HIDDEN_SIZE)
    assert jnp.allclose(out, out_r, atol=2e-3, rtol=2e-3)
    assert jnp.allclose(h_out, h_r, atol=2e-3, rtol=2e-3)
    assert jnp.allclose(c_out, c_r, atol=2e-3, rtol=2e-3)

    print("KERNEL_OK")
</pallas_src>

<mosaic_0001>
module attributes {stable_mosaic.version = 11 : i64} {
  func.func @lstm_kernel(%arg0: memref<64x2xf32, #tpu.memory_space<vmem>>, %arg1: memref<4x512xf32, #tpu.memory_space<vmem>>, %arg2: memref<128x512xf32, #tpu.memory_space<vmem>>, %arg3: memref<16x128xf32, #tpu.memory_space<vmem>>, %arg4: memref<128x128xf32, #tpu.memory_space<vmem>>, %arg5: memref<8x384xf32, #tpu.memory_space<vmem>>, %arg6: memref<64x512xf32, #tpu.memory_space<vmem>>) attributes {dimension_semantics = [], scalar_prefetch = 0 : i64, scratch_operands = 1 : i64, tpu.core_type = #tpu.core_type<tc>} {
    %c0 = arith.constant 0 : index
    %c0_0 = arith.constant 0 : index
    %0 = vector.load %arg0[%c0, %c0_0] : memref<64x2xf32, #tpu.memory_space<vmem>>, vector<64x1xf32>
    %c0_1 = arith.constant 0 : index
    %c0_2 = arith.constant 0 : index
    %1 = vector.load %arg1[%c0_1, %c0_2] : memref<4x512xf32, #tpu.memory_space<vmem>>, vector<1x512xf32>
    %2 = vector.broadcast %0 : vector<64x1xf32> to vector<64x512xf32>
    %3 = vector.broadcast %1 : vector<1x512xf32> to vector<64x512xf32>
    %4 = arith.mulf %2, %3 : vector<64x512xf32>
    %c0_3 = arith.constant 0 : index
    %c1 = arith.constant 1 : index
    %5 = vector.load %arg0[%c0_3, %c1] : memref<64x2xf32, #tpu.memory_space<vmem>>, vector<64x1xf32>
    %c1_4 = arith.constant 1 : index
    %c0_5 = arith.constant 0 : index
    %6 = vector.load %arg1[%c1_4, %c0_5] : memref<4x512xf32, #tpu.memory_space<vmem>>, vector<1x512xf32>
    %7 = vector.broadcast %5 : vector<64x1xf32> to vector<64x512xf32>
    %8 = vector.broadcast %6 : vector<1x512xf32> to vector<64x512xf32>
    %9 = arith.mulf %7, %8 : vector<64x512xf32>
    %10 = arith.addf %4, %9 : vector<64x512xf32>
    %c2 = arith.constant 2 : index
    %c0_6 = arith.constant 0 : index
    %11 = vector.load %arg1[%c2, %c0_6] : memref<4x512xf32, #tpu.memory_space<vmem>>, vector<1x512xf32>
    %12 = vector.broadcast %11 : vector<1x512xf32> to vector<64x512xf32>
    %13 = arith.addf %10, %12 : vector<64x512xf32>
    %c0_7 = arith.constant 0 : index
    %c0_8 = arith.constant 0 : index
    %14 = vector.load %arg6[%c0_7, %c0_8] : memref<64x512xf32, #tpu.memory_space<vmem>>, vector<64x512xf32>
    tpu.vector_store %arg6[%c0_7, %c0_8], %13 {strides = array<i32>} : memref<64x512xf32, #tpu.memory_space<vmem>>, vector<64x512xf32>,
    %c0_9 = arith.constant 0 : index
    %c0_10 = arith.constant 0 : index
    %15 = vector.load %arg3[%c0_9, %c0_10] : memref<16x128xf32, #tpu.memory_space<vmem>>, vector<8x128xf32>
    %c8 = arith.constant 8 : index
    %c0_11 = arith.constant 0 : index
    %16 = vector.load %arg3[%c8, %c0_11] : memref<16x128xf32, #tpu.memory_space<vmem>>, vector<8x128xf32>
    %c0_12 = arith.constant 0 : index
    %c0_13 = arith.constant 0 : index
    %17 = vector.load %arg6[%c0_12, %c0_13] : memref<64x512xf32, #tpu.memory_space<vmem>>, vector<8x512xf32>
    %c0_14 = arith.constant 0 : index
    %c0_15 = arith.constant 0 : index
    %18 = vector.load %arg2[%c0_14, %c0_15] : memref<128x512xf32, #tpu.memory_space<vmem>>, vector<128x512xf32>
    %cst = arith.constant dense<0.000000e+00> : vector<8x512xf32>
    %19 = tpu.matmul %15, %18, %cst {dimension_numbers = #tpu.dot_dimension_numbers<[1], [0], [0], [1], [0, 0, 1, 1], [], []>} : vector<8x128xf32>, vector<128x512xf32>, vector<8x512xf32> -> vector<8x512xf32>
    %20 = arith.addf %17, %19 : vector<8x512xf32>
    %21 = vector.extract_strided_slice %20 {offsets = [0, 0], sizes = [8, 128], strides = [1, 1]} : vector<8x512xf32> to vector<8x128xf32>
    %cst_16 = arith.constant 5.000000e-01 : f32
    %22 = vector.broadcast %cst_16 : f32 to vector<8x128xf32>
    %23 = arith.mulf %22, %21 : vector<8x128xf32>
    %24 = math.tanh %23 : vector<8x128xf32>
    %cst_17 = arith.constant 1.000000e+00 : f32
    %25 = vector.broadcast %cst_17 : f32 to vector<8x128xf32>
    %26 = arith.addf %25, %24 : vector<8x128xf32>
    %cst_18 = arith.constant 5.000000e-01 : f32
    %27 = vector.broadcast %cst_18 : f32 to vector<8x128xf32>
    %28 = arith.mulf %27, %26 : vector<8x128xf32>
    %29 = vector.extract_strided_slice %20 {offsets = [0, 128], sizes = [8, 128], strides = [1, 1]} : vector<8x512xf32> to vector<8x128xf32>
    %cst_19 = arith.constant 5.000000e-01 : f32
    %30 = vector.broadcast %cst_19 : f32 to vector<8x128xf32>
    %31 = arith.mulf %30, %29 : vector<8x128xf32>
    %32 = math.tanh %31 : vector<8x128xf32>
    %cst_20 = arith.constant 1.000000e+00 : f32
    %33 = vector.broadcast %cst_20 : f32 to vector<8x128xf32>
    %34 = arith.addf %33, %32 : vector<8x128xf32>
    %cst_21 = arith.constant 5.000000e-01 : f32
    %35 = vector.broadcast %cst_21 : f32 to vector<8x128xf32>
    %36 = arith.mulf %35, %34 : vector<8x128xf32>
    %37 = vector.extract_strided_slice %20 {offsets = [0, 256], sizes = [8, 128], strides = [1, 1]} : vector<8x512xf32> to vector<8x128xf32>
    %38 = math.tanh %37 : vector<8x128xf32>
    %39 = vector.extract_strided_slice %20 {offsets = [0, 384], sizes = [8, 128], strides = [1, 1]} : vector<8x512xf32> to vector<8x128xf32>
    %cst_22 = arith.constant 5.000000e-01 : f32
    %40 = vector.broadcast %cst_22 : f32 to vector<8x128xf32>
    %41 = arith.mulf %40, %39 : vector<8x128xf32>
    %42 = math.tanh %41 : vector<8x128xf32>
    %cst_23 = arith.constant 1.000000e+00 : f32
    %43 = vector.broadcast %cst_23 : f32 to vector<8x128xf32>
    %44 = arith.addf %43, %42 : vector<8x128xf32>
    %cst_24 = arith.constant 5.000000e-01 : f32
    %45 = vector.broadcast %cst_24 : f32 to vector<8x128xf32>
    %46 = arith.mulf %45, %44 : vector<8x128xf32>
    %47 = arith.mulf %36, %16 : vector<8x128xf32>
    %48 = arith.mulf %28, %38 : vector<8x128xf32>
    %49 = arith.addf %47, %48 : vector<8x128xf32>
    %50 = math.tanh %49 : vector<8x128xf32>
    %51 = arith.mulf %46, %50 : vector<8x128xf32>
    %c8_25 = arith.constant 8 : index
    %c0_26 = arith.constant 0 : index
    %52 = vector.load %arg6[%c8_25, %c0_26] : memref<64x512xf32, #tpu.memory_space<vmem>>, vector<8x512xf32>
    %c0_27 = arith.constant 0 : index
    %c0_28 = arith.constant 0 : index
    %53 = vector.load %arg2[%c0_27, %c0_28] : memref<128x512xf32, #tpu.memory_space<vmem>>, vector<128x512xf32>
    %cst_29 = arith.constant dense<0.000000e+00> : vector<8x512xf32>
    %54 = tpu.matmul %51, %53, %cst_29 {dimension_numbers = #tpu.dot_dimension_numbers<[1], [0], [0], [1], [0, 0, 1, 1], [], []>} : vector<8x128xf32>, vector<128x512xf32>, vector<8x512xf32> -> vector<8x512xf32>
    %55 = arith.addf %52, %54 : vector<8x512xf32>
    %56 = vector.extract_strided_slice %55 {offsets = [0, 0], sizes = [8, 128], strides = [1, 1]} : vector<8x512xf32> to vector<8x128xf32>
    %cst_30 = arith.constant 5.000000e-01 : f32
    %57 = vector.broadcast %cst_30 : f32 to vector<8x128xf32>
    %58 = arith.mulf %57, %56 : vector<8x128xf32>
    %59 = math.tanh %58 : vector<8x128xf32>
    %cst_31 = arith.constant 1.000000e+00 : f32
    %60 = vector.broadcast %cst_31 : f32 to vector<8x128xf32>
    %61 = arith.addf %60, %59 : vector<8x128xf32>
    %cst_32 = arith.constant 5.000000e-01 : f32
    %62 = vector.broadcast %cst_32 : f32 to vector<8x128xf32>
    %63 = arith.mulf %62, %61 : vector<8x128xf32>
    %64 = vector.extract_strided_slice %55 {offsets = [0, 128], sizes = [8, 128], strides = [1, 1]} : vector<8x512xf32> to vector<8x128xf32>
    %cst_33 = arith.constant 5.000000e-01 : f32
    %65 = vector.broadcast %cst_33 : f32 to vector<8x128xf32>
    %66 = arith.mulf %65, %64 : vector<8x128xf32>
    %67 = math.tanh %66 : vector<8x128xf32>
    %cst_34 = arith.constant 1.000000e+00 : f32
    %68 = vector.broadcast %cst_34 : f32 to vector<8x128xf32>
    %69 = arith.addf %68, %67 : vector<8x128xf32>
    %cst_35 = arith.constant 5.000000e-01 : f32
    %70 = vector.broadcast %cst_35 : f32 to vector<8x128xf32>
    %71 = arith.mulf %70, %69 : vector<8x128xf32>
    %72 = vector.extract_strided_slice %55 {offsets = [0, 256], sizes = [8, 128], strides = [1, 1]} : vector<8x512xf32> to vector<8x128xf32>
    %73 = math.tanh %72 : vector<8x128xf32>
    %74 = vector.extract_strided_slice %55 {offsets = [0, 384], sizes = [8, 128], strides = [1, 1]} : vector<8x512xf32> to vector<8x128xf32>
    %cst_36 = arith.constant 5.000000e-01 : f32
    %75 = vector.broadcast %cst_36 : f32 to vector<8x128xf32>
    %76 = arith.mulf %75, %74 : vector<8x128xf32>
    %77 = math.tanh %76 : vector<8x128xf32>
    %cst_37 = arith.constant 1.000000e+00 : f32
    %78 = vector.broadcast %cst_37 : f32 to vector<8x128xf32>
    %79 = arith.addf %78, %77 : vector<8x128xf32>
    %cst_38 = arith.constant 5.000000e-01 : f32
    %80 = vector.broadcast %cst_38 : f32 to vector<8x128xf32>
    %81 = arith.mulf %80, %79 : vector<8x128xf32>
    %82 = arith.mulf %71, %49 : vector<8x128xf32>
    %83 = arith.mulf %63, %73 : vector<8x128xf32>
    %84 = arith.addf %82, %83 : vector<8x128xf32>
    %85 = math.tanh %84 : vector<8x128xf32>
    %86 = arith.mulf %81, %85 : vector<8x128xf32>
    %c16 = arith.constant 16 : index
    %c0_39 = arith.constant 0 : index
    %87 = vector.load %arg6[%c16, %c0_39] : memref<64x512xf32, #tpu.memory_space<vmem>>, vector<8x512xf32>
    %c0_40 = arith.constant 0 : index
    %c0_41 = arith.constant 0 : index
    %88 = vector.load %arg2[%c0_40, %c0_41] : memref<128x512xf32, #tpu.memory_space<vmem>>, vector<128x512xf32>
    %cst_42 = arith.constant dense<0.000000e+00> : vector<8x512xf32>
    %89 = tpu.matmul %86, %88, %cst_42 {dimension_numbers = #tpu.dot_dimension_numbers<[1], [0], [0], [1], [0, 0, 1, 1], [], []>} : vector<8x128xf32>, vector<128x512xf32>, vector<8x512xf32> -> vector<8x512xf32>
    %90 = arith.addf %87, %89 : vector<8x512xf32>
    %91 = vector.extract_strided_slice %90 {offsets = [0, 0], sizes = [8, 128], strides = [1, 1]} : vector<8x512xf32> to vector<8x128xf32>
    %cst_43 = arith.constant 5.000000e-01 : f32
    %92 = vector.broadcast %cst_43 : f32 to vector<8x128xf32>
    %93 = arith.mulf %92, %91 : vector<8x128xf32>
    %94 = math.tanh %93 : vector<8x128xf32>
    %cst_44 = arith.constant 1.000000e+00 : f32
    %95 = vector.broadcast %cst_44 : f32 to vector<8x128xf32>
    %96 = arith.addf %95, %94 : vector<8x128xf32>
    %cst_45 = arith.constant 5.000000e-01 : f32
    %97 = vector.broadcast %cst_45 : f32 to vector<8x128xf32>
    %98 = arith.mulf %97, %96 : vector<8x128xf32>
    %99 = vector.extract_strided_slice %90 {offsets = [0, 128], sizes = [8, 128], strides = [1, 1]} : vector<8x512xf32> to vector<8x128xf32>
    %cst_46 = arith.constant 5.000000e-01 : f32
    %100 = vector.broadcast %cst_46 : f32 to vector<8x128xf32>
    %101 = arith.mulf %100, %99 : vector<8x128xf32>
    %102 = math.tanh %101 : vector<8x128xf32>
    %cst_47 = arith.constant 1.000000e+00 : f32
    %103 = vector.broadcast %cst_47 : f32 to vector<8x128xf32>
    %104 = arith.addf %103, %102 : vector<8x128xf32>
    %cst_48 = arith.constant 5.000000e-01 : f32
    %105 = vector.broadcast %cst_48 : f32 to vector<8x128xf32>
    %106 = arith.mulf %105, %104 : vector<8x128xf32>
    %107 = vector.extract_strided_slice %90 {offsets = [0, 256], sizes = [8, 128], strides = [1, 1]} : vector<8x512xf32> to vector<8x128xf32>
    %108 = math.tanh %107 : vector<8x128xf32>
    %109 = vector.extract_strided_slice %90 {offsets = [0, 384], sizes = [8, 128], strides = [1, 1]} : vector<8x512xf32> to vector<8x128xf32>
    %cst_49 = arith.constant 5.000000e-01 : f32
    %110 = vector.broadcast %cst_49 : f32 to vector<8x128xf32>
    %111 = arith.mulf %110, %109 : vector<8x128xf32>
    %112 = math.tanh %111 : vector<8x128xf32>
    %cst_50 = arith.constant 1.000000e+00 : f32
    %113 = vector.broadcast %cst_50 : f32 to vector<8x128xf32>
    %114 = arith.addf %113, %112 : vector<8x128xf32>
    %cst_51 = arith.constant 5.000000e-01 : f32
    %115 = vector.broadcast %cst_51 : f32 to vector<8x128xf32>
    %116 = arith.mulf %115, %114 : vector<8x128xf32>
    %117 = arith.mulf %106, %84 : vector<8x128xf32>
    %118 = arith.mulf %98, %108 : vector<8x128xf32>
    %119 = arith.addf %117, %118 : vector<8x128xf32>
    %120 = math.tanh %119 : vector<8x128xf32>
    %121 = arith.mulf %116, %120 : vector<8x128xf32>
    %c24 = arith.constant 24 : index
    %c0_52 = arith.constant 0 : index
    %122 = vector.load %arg6[%c24, %c0_52] : memref<64x512xf32, #tpu.memory_space<vmem>>, vector<8x512xf32>
    %c0_53 = arith.constant 0 : index
    %c0_54 = arith.constant 0 : index
    %123 = vector.load %arg2[%c0_53, %c0_54] : memref<128x512xf32, #tpu.memory_space<vmem>>, vector<128x512xf32>
    %cst_55 = arith.constant dense<0.000000e+00> : vector<8x512xf32>
    %124 = tpu.matmul %121, %123, %cst_55 {dimension_numbers = #tpu.dot_dimension_numbers<[1], [0], [0], [1], [0, 0, 1, 1], [], []>} : vector<8x128xf32>, vector<128x512xf32>, vector<8x512xf32> -> vector<8x512xf32>
    %125 = arith.addf %122, %124 : vector<8x512xf32>
    %126 = vector.extract_strided_slice %125 {offsets = [0, 0], sizes = [8, 128], strides = [1, 1]} : vector<8x512xf32> to vector<8x128xf32>
    %cst_56 = arith.constant 5.000000e-01 : f32
    %127 = vector.broadcast %cst_56 : f32 to vector<8x128xf32>
    %128 = arith.mulf %127, %126 : vector<8x128xf32>
    %129 = math.tanh %128 : vector<8x128xf32>
    %cst_57 = arith.constant 1.000000e+00 : f32
    %130 = vector.broadcast %cst_57 : f32 to vector<8x128xf32>
    %131 = arith.addf %130, %129 : vector<8x128xf32>
    %cst_58 = arith.constant 5.000000e-01 : f32
    %132 = vector.broadcast %cst_58 : f32 to vector<8x128xf32>
    %133 = arith.mulf %132, %131 : vector<8x128xf32>
    %134 = vector.extract_strided_slice %125 {offsets = [0, 128], sizes = [8, 128], strides = [1, 1]} : vector<8x512xf32> to vector<8x128xf32>
    %cst_59 = arith.constant 5.000000e-01 : f32
    %135 = vector.broadcast %cst_59 : f32 to vector<8x128xf32>
    %136 = arith.mulf %135, %134 : vector<8x128xf32>
    %137 = math.tanh %136 : vector<8x128xf32>
    %cst_60 = arith.constant 1.000000e+00 : f32
    %138 = vector.broadcast %cst_60 : f32 to vector<8x128xf32>
    %139 = arith.addf %138, %137 : vector<8x128xf32>
    %cst_61 = arith.constant 5.000000e-01 : f32
    %140 = vector.broadcast %cst_61 : f32 to vector<8x128xf32>
    %141 = arith.mulf %140, %139 : vector<8x128xf32>
    %142 = vector.extract_strided_slice %125 {offsets = [0, 256], sizes = [8, 128], strides = [1, 1]} : vector<8x512xf32> to vector<8x128xf32>
    %143 = math.tanh %142 : vector<8x128xf32>
    %144 = vector.extract_strided_slice %125 {offsets = [0, 384], sizes = [8, 128], strides = [1, 1]} : vector<8x512xf32> to vector<8x128xf32>
    %cst_62 = arith.constant 5.000000e-01 : f32
    %145 = vector.broadcast %cst_62 : f32 to vector<8x128xf32>
    %146 = arith.mulf %145, %144 : vector<8x128xf32>
    %147 = math.tanh %146 : vector<8x128xf32>
    %cst_63 = arith.constant 1.000000e+00 : f32
    %148 = vector.broadcast %cst_63 : f32 to vector<8x128xf32>
    %149 = arith.addf %148, %147 : vector<8x128xf32>
    %cst_64 = arith.constant 5.000000e-01 : f32
    %150 = vector.broadcast %cst_64 : f32 to vector<8x128xf32>
    %151 = arith.mulf %150, %149 : vector<8x128xf32>
    %152 = arith.mulf %141, %119 : vector<8x128xf32>
    %153 = arith.mulf %133, %143 : vector<8x128xf32>
    %154 = arith.addf %152, %153 : vector<8x128xf32>
    %155 = math.tanh %154 : vector<8x128xf32>
    %156 = arith.mulf %151, %155 : vector<8x128xf32>
    %c32 = arith.constant 32 : index
    %c0_65 = arith.constant 0 : index
    %157 = vector.load %arg6[%c32, %c0_65] : memref<64x512xf32, #tpu.memory_space<vmem>>, vector<8x512xf32>
    %c0_66 = arith.constant 0 : index
    %c0_67 = arith.constant 0 : index
    %158 = vector.load %arg2[%c0_66, %c0_67] : memref<128x512xf32, #tpu.memory_space<vmem>>, vector<128x512xf32>
    %cst_68 = arith.constant dense<0.000000e+00> : vector<8x512xf32>
    %159 = tpu.matmul %156, %158, %cst_68 {dimension_numbers = #tpu.dot_dimension_numbers<[1], [0], [0], [1], [0, 0, 1, 1], [], []>} : vector<8x128xf32>, vector<128x512xf32>, vector<8x512xf32> -> vector<8x512xf32>
    %160 = arith.addf %157, %159 : vector<8x512xf32>
    %161 = vector.extract_strided_slice %160 {offsets = [0, 0], sizes = [8, 128], strides = [1, 1]} : vector<8x512xf32> to vector<8x128xf32>
    %cst_69 = arith.constant 5.000000e-01 : f32
    %162 = vector.broadcast %cst_69 : f32 to vector<8x128xf32>
    %163 = arith.mulf %162, %161 : vector<8x128xf32>
    %164 = math.tanh %163 : vector<8x128xf32>
    %cst_70 = arith.constant 1.000000e+00 : f32
    %165 = vector.broadcast %cst_70 : f32 to vector<8x128xf32>
    %166 = arith.addf %165, %164 : vector<8x128xf32>
    %cst_71 = arith.constant 5.000000e-01 : f32
    %167 = vector.broadcast %cst_71 : f32 to vector<8x128xf32>
    %168 = arith.mulf %167, %166 : vector<8x128xf32>
    %169 = vector.extract_strided_slice %160 {offsets = [0, 128], sizes = [8, 128], strides = [1, 1]} : vector<8x512xf32> to vector<8x128xf32>
    %cst_72 = arith.constant 5.000000e-01 : f32
    %170 = vector.broadcast %cst_72 : f32 to vector<8x128xf32>
    %171 = arith.mulf %170, %169 : vector<8x128xf32>
    %172 = math.tanh %171 : vector<8x128xf32>
    %cst_73 = arith.constant 1.000000e+00 : f32
    %173 = vector.broadcast %cst_73 : f32 to vector<8x128xf32>
    %174 = arith.addf %173, %172 : vector<8x128xf32>
    %cst_74 = arith.constant 5.000000e-01 : f32
    %175 = vector.broadcast %cst_74 : f32 to vector<8x128xf32>
    %176 = arith.mulf %175, %174 : vector<8x128xf32>
    %177 = vector.extract_strided_slice %160 {offsets = [0, 256], sizes = [8, 128], strides = [1, 1]} : vector<8x512xf32> to vector<8x128xf32>
    %178 = math.tanh %177 : vector<8x128xf32>
    %179 = vector.extract_strided_slice %160 {offsets = [0, 384], sizes = [8, 128], strides = [1, 1]} : vector<8x512xf32> to vector<8x128xf32>
    %cst_75 = arith.constant 5.000000e-01 : f32
    %180 = vector.broadcast %cst_75 : f32 to vector<8x128xf32>
    %181 = arith.mulf %180, %179 : vector<8x128xf32>
    %182 = math.tanh %181 : vector<8x128xf32>
    %cst_76 = arith.constant 1.000000e+00 : f32
    %183 = vector.broadcast %cst_76 : f32 to vector<8x128xf32>
    %184 = arith.addf %183, %182 : vector<8x128xf32>
    %cst_77 = arith.constant 5.000000e-01 : f32
    %185 = vector.broadcast %cst_77 : f32 to vector<8x128xf32>
    %186 = arith.mulf %185, %184 : vector<8x128xf32>
    %187 = arith.mulf %176, %154 : vector<8x128xf32>
    %188 = arith.mulf %168, %178 : vector<8x128xf32>
    %189 = arith.addf %187, %188 : vector<8x128xf32>
    %190 = math.tanh %189 : vector<8x128xf32>
    %191 = arith.mulf %186, %190 : vector<8x128xf32>
    %c40 = arith.constant 40 : index
    %c0_78 = arith.constant 0 : index
    %192 = vector.load %arg6[%c40, %c0_78] : memref<64x512xf32, #tpu.memory_space<vmem>>, vector<8x512xf32>
    %c0_79 = arith.constant 0 : index
    %c0_80 = arith.constant 0 : index
    %193 = vector.load %arg2[%c0_79, %c0_80] : memref<128x512xf32, #tpu.memory_space<vmem>>, vector<128x512xf32>
    %cst_81 = arith.constant dense<0.000000e+00> : vector<8x512xf32>
    %194 = tpu.matmul %191, %193, %cst_81 {dimension_numbers = #tpu.dot_dimension_numbers<[1], [0], [0], [1], [0, 0, 1, 1], [], []>} : vector<8x128xf32>, vector<128x512xf32>, vector<8x512xf32> -> vector<8x512xf32>
    %195 = arith.addf %192, %194 : vector<8x512xf32>
    %196 = vector.extract_strided_slice %195 {offsets = [0, 0], sizes = [8, 128], strides = [1, 1]} : vector<8x512xf32> to vector<8x128xf32>
    %cst_82 = arith.constant 5.000000e-01 : f32
    %197 = vector.broadcast %cst_82 : f32 to vector<8x128xf32>
    %198 = arith.mulf %197, %196 : vector<8x128xf32>
    %199 = math.tanh %198 : vector<8x128xf32>
    %cst_83 = arith.constant 1.000000e+00 : f32
    %200 = vector.broadcast %cst_83 : f32 to vector<8x128xf32>
    %201 = arith.addf %200, %199 : vector<8x128xf32>
    %cst_84 = arith.constant 5.000000e-01 : f32
    %202 = vector.broadcast %cst_84 : f32 to vector<8x128xf32>
    %203 = arith.mulf %202, %201 : vector<8x128xf32>
    %204 = vector.extract_strided_slice %195 {offsets = [0, 128], sizes = [8, 128], strides = [1, 1]} : vector<8x512xf32> to vector<8x128xf32>
    %cst_85 = arith.constant 5.000000e-01 : f32
    %205 = vector.broadcast %cst_85 : f32 to vector<8x128xf32>
    %206 = arith.mulf %205, %204 : vector<8x128xf32>
    %207 = math.tanh %206 : vector<8x128xf32>
    %cst_86 = arith.constant 1.000000e+00 : f32
    %208 = vector.broadcast %cst_86 : f32 to vector<8x128xf32>
    %209 = arith.addf %208, %207 : vector<8x128xf32>
    %cst_87 = arith.constant 5.000000e-01 : f32
    %210 = vector.broadcast %cst_87 : f32 to vector<8x128xf32>
    %211 = arith.mulf %210, %209 : vector<8x128xf32>
    %212 = vector.extract_strided_slice %195 {offsets = [0, 256], sizes = [8, 128], strides = [1, 1]} : vector<8x512xf32> to vector<8x128xf32>
    %213 = math.tanh %212 : vector<8x128xf32>
    %214 = vector.extract_strided_slice %195 {offsets = [0, 384], sizes = [8, 128], strides = [1, 1]} : vector<8x512xf32> to vector<8x128xf32>
    %cst_88 = arith.constant 5.000000e-01 : f32
    %215 = vector.broadcast %cst_88 : f32 to vector<8x128xf32>
    %216 = arith.mulf %215, %214 : vector<8x128xf32>
    %217 = math.tanh %216 : vector<8x128xf32>
    %cst_89 = arith.constant 1.000000e+00 : f32
    %218 = vector.broadcast %cst_89 : f32 to vector<8x128xf32>
    %219 = arith.addf %218, %217 : vector<8x128xf32>
    %cst_90 = arith.constant 5.000000e-01 : f32
    %220 = vector.broadcast %cst_90 : f32 to vector<8x128xf32>
    %221 = arith.mulf %220, %219 : vector<8x128xf32>
    %222 = arith.mulf %211, %189 : vector<8x128xf32>
    %223 = arith.mulf %203, %213 : vector<8x128xf32>
    %224 = arith.addf %222, %223 : vector<8x128xf32>
    %225 = math.tanh %224 : vector<8x128xf32>
    %226 = arith.mulf %221, %225 : vector<8x128xf32>
    %c48 = arith.constant 48 : index
    %c0_91 = arith.constant 0 : index
    %227 = vector.load %arg6[%c48, %c0_91] : memref<64x512xf32, #tpu.memory_space<vmem>>, vector<8x512xf32>
    %c0_92 = arith.constant 0 : index
    %c0_93 = arith.constant 0 : index
    %228 = vector.load %arg2[%c0_92, %c0_93] : memref<128x512xf32, #tpu.memory_space<vmem>>, vector<128x512xf32>
    %cst_94 = arith.constant dense<0.000000e+00> : vector<8x512xf32>
    %229 = tpu.matmul %226, %228, %cst_94 {dimension_numbers = #tpu.dot_dimension_numbers<[1], [0], [0], [1], [0, 0, 1, 1], [], []>} : vector<8x128xf32>, vector<128x512xf32>, vector<8x512xf32> -> vector<8x512xf32>
    %230 = arith.addf %227, %229 : vector<8x512xf32>
    %231 = vector.extract_strided_slice %230 {offsets = [0, 0], sizes = [8, 128], strides = [1, 1]} : vector<8x512xf32> to vector<8x128xf32>
    %cst_95 = arith.constant 5.000000e-01 : f32
    %232 = vector.broadcast %cst_95 : f32 to vector<8x128xf32>
    %233 = arith.mulf %232, %231 : vector<8x128xf32>
    %234 = math.tanh %233 : vector<8x128xf32>
    %cst_96 = arith.constant 1.000000e+00 : f32
    %235 = vector.broadcast %cst_96 : f32 to vector<8x128xf32>
    %236 = arith.addf %235, %234 : vector<8x128xf32>
    %cst_97 = arith.constant 5.000000e-01 : f32
    %237 = vector.broadcast %cst_97 : f32 to vector<8x128xf32>
    %238 = arith.mulf %237, %236 : vector<8x128xf32>
    %239 = vector.extract_strided_slice %230 {offsets = [0, 128], sizes = [8, 128], strides = [1, 1]} : vector<8x512xf32> to vector<8x128xf32>
    %cst_98 = arith.constant 5.000000e-01 : f32
    %240 = vector.broadcast %cst_98 : f32 to vector<8x128xf32>
    %241 = arith.mulf %240, %239 : vector<8x128xf32>
    %242 = math.tanh %241 : vector<8x128xf32>
    %cst_99 = arith.constant 1.000000e+00 : f32
    %243 = vector.broadcast %cst_99 : f32 to vector<8x128xf32>
    %244 = arith.addf %243, %242 : vector<8x128xf32>
    %cst_100 = arith.constant 5.000000e-01 : f32
    %245 = vector.broadcast %cst_100 : f32 to vector<8x128xf32>
    %246 = arith.mulf %245, %244 : vector<8x128xf32>
    %247 = vector.extract_strided_slice %230 {offsets = [0, 256], sizes = [8, 128], strides = [1, 1]} : vector<8x512xf32> to vector<8x128xf32>
    %248 = math.tanh %247 : vector<8x128xf32>
    %249 = vector.extract_strided_slice %230 {offsets = [0, 384], sizes = [8, 128], strides = [1, 1]} : vector<8x512xf32> to vector<8x128xf32>
    %cst_101 = arith.constant 5.000000e-01 : f32
    %250 = vector.broadcast %cst_101 : f32 to vector<8x128xf32>
    %251 = arith.mulf %250, %249 : vector<8x128xf32>
    %252 = math.tanh %251 : vector<8x128xf32>
    %cst_102 = arith.constant 1.000000e+00 : f32
    %253 = vector.broadcast %cst_102 : f32 to vector<8x128xf32>
    %254 = arith.addf %253, %252 : vector<8x128xf32>
    %cst_103 = arith.constant 5.000000e-01 : f32
    %255 = vector.broadcast %cst_103 : f32 to vector<8x128xf32>
    %256 = arith.mulf %255, %254 : vector<8x128xf32>
    %257 = arith.mulf %246, %224 : vector<8x128xf32>
    %258 = arith.mulf %238, %248 : vector<8x128xf32>
    %259 = arith.addf %257, %258 : vector<8x128xf32>
    %260 = math.tanh %259 : vector<8x128xf32>
    %261 = arith.mulf %256, %260 : vector<8x128xf32>
    %c56 = arith.constant 56 : index
    %c0_104 = arith.constant 0 : index
    %262 = vector.load %arg6[%c56, %c0_104] : memref<64x512xf32, #tpu.memory_space<vmem>>, vector<8x512xf32>
    %c0_105 = arith.constant 0 : index
    %c0_106 = arith.constant 0 : index
    %263 = vector.load %arg2[%c0_105, %c0_106] : memref<128x512xf32, #tpu.memory_space<vmem>>, vector<128x512xf32>
    %cst_107 = arith.constant dense<0.000000e+00> : vector<8x512xf32>
    %264 = tpu.matmul %261, %263, %cst_107 {dimension_numbers = #tpu.dot_dimension_numbers<[1], [0], [0], [1], [0, 0, 1, 1], [], []>} : vector<8x128xf32>, vector<128x512xf32>, vector<8x512xf32> -> vector<8x512xf32>
    %265 = arith.addf %262, %264 : vector<8x512xf32>
    %266 = vector.extract_strided_slice %265 {offsets = [0, 0], sizes = [8, 128], strides = [1, 1]} : vector<8x512xf32> to vector<8x128xf32>
    %cst_108 = arith.constant 5.000000e-01 : f32
    %267 = vector.broadcast %cst_108 : f32 to vector<8x128xf32>
    %268 = arith.mulf %267, %266 : vector<8x128xf32>
    %269 = math.tanh %268 : vector<8x128xf32>
    %cst_109 = arith.constant 1.000000e+00 : f32
    %270 = vector.broadcast %cst_109 : f32 to vector<8x128xf32>
    %271 = arith.addf %270, %269 : vector<8x128xf32>
    %cst_110 = arith.constant 5.000000e-01 : f32
    %272 = vector.broadcast %cst_110 : f32 to vector<8x128xf32>
    %273 = arith.mulf %272, %271 : vector<8x128xf32>
    %274 = vector.extract_strided_slice %265 {offsets = [0, 128], sizes = [8, 128], strides = [1, 1]} : vector<8x512xf32> to vector<8x128xf32>
    %cst_111 = arith.constant 5.000000e-01 : f32
    %275 = vector.broadcast %cst_111 : f32 to vector<8x128xf32>
    %276 = arith.mulf %275, %274 : vector<8x128xf32>
    %277 = math.tanh %276 : vector<8x128xf32>
    %cst_112 = arith.constant 1.000000e+00 : f32
    %278 = vector.broadcast %cst_112 : f32 to vector<8x128xf32>
    %279 = arith.addf %278, %277 : vector<8x128xf32>
    %cst_113 = arith.constant 5.000000e-01 : f32
    %280 = vector.broadcast %cst_113 : f32 to vector<8x128xf32>
    %281 = arith.mulf %280, %279 : vector<8x128xf32>
    %282 = vector.extract_strided_slice %265 {offsets = [0, 256], sizes = [8, 128], strides = [1, 1]} : vector<8x512xf32> to vector<8x128xf32>
    %283 = math.tanh %282 : vector<8x128xf32>
    %284 = vector.extract_strided_slice %265 {offsets = [0, 384], sizes = [8, 128], strides = [1, 1]} : vector<8x512xf32> to vector<8x128xf32>
    %cst_114 = arith.constant 5.000000e-01 : f32
    %285 = vector.broadcast %cst_114 : f32 to vector<8x128xf32>
    %286 = arith.mulf %285, %284 : vector<8x128xf32>
    %287 = math.tanh %286 : vector<8x128xf32>
    %cst_115 = arith.constant 1.000000e+00 : f32
    %288 = vector.broadcast %cst_115 : f32 to vector<8x128xf32>
    %289 = arith.addf %288, %287 : vector<8x128xf32>
    %cst_116 = arith.constant 5.000000e-01 : f32
    %290 = vector.broadcast %cst_116 : f32 to vector<8x128xf32>
    %291 = arith.mulf %290, %289 : vector<8x128xf32>
    %292 = arith.mulf %281, %259 : vector<8x128xf32>
    %293 = arith.mulf %273, %283 : vector<8x128xf32>
    %294 = arith.addf %292, %293 : vector<8x128xf32>
    %295 = math.tanh %294 : vector<8x128xf32>
    %296 = arith.mulf %291, %295 : vector<8x128xf32>
    %c0_117 = arith.constant 0 : index
    %c0_118 = arith.constant 0 : index
    %297 = vector.load %arg5[%c0_117, %c0_118] : memref<8x384xf32, #tpu.memory_space<vmem>>, vector<8x128xf32>
    tpu.vector_store %arg5[%c0_117, %c0_118], %296 {strides = array<i32>} : memref<8x384xf32, #tpu.memory_space<vmem>>, vector<8x128xf32>,
    %c0_119 = arith.constant 0 : index
    %c128 = arith.constant 128 : index
    %298 = vector.load %arg5[%c0_119, %c128] : memref<8x384xf32, #tpu.memory_space<vmem>>, vector<8x128xf32>
    tpu.vector_store %arg5[%c0_119, %c128], %294 {strides = array<i32>} : memref<8x384xf32, #tpu.memory_space<vmem>>, vector<8x128xf32>,
    %c0_120 = arith.constant 0 : index
    %c0_121 = arith.constant 0 : index
    %299 = vector.load %arg4[%c0_120, %c0_121] : memref<128x128xf32, #tpu.memory_space<vmem>>, vector<128x128xf32>
    %cst_122 = arith.constant dense<0.000000e+00> : vector<8x128xf32>
    %300 = tpu.matmul %296, %299, %cst_122 {dimension_numbers = #tpu.dot_dimension_numbers<[1], [0], [0], [1], [0, 0, 1, 1], [], []>} : vector<8x128xf32>, vector<128x128xf32>, vector<8x128xf32> -> vector<8x128xf32>
    %c3 = arith.constant 3 : index
    %c0_123 = arith.constant 0 : index
    %301 = vector.load %arg1[%c3, %c0_123] : memref<4x512xf32, #tpu.memory_space<vmem>>, vector<1x128xf32>
    %302 = vector.broadcast %301 : vector<1x128xf32> to vector<8x128xf32>
    %303 = arith.addf %300, %302 : vector<8x128xf32>
    %c0_124 = arith.constant 0 : index
    %c256 = arith.constant 256 : index
    %304 = vector.load %arg5[%c0_124, %c256] : memref<8x384xf32, #tpu.memory_space<vmem>>, vector<8x128xf32>
    tpu.vector_store %arg5[%c0_124, %c256], %303 {strides = array<i32>} : memref<8x384xf32, #tpu.memory_space<vmem>>, vector<8x128xf32>,
    return
  }
}

</mosaic_0001>

<bundles_post_ra>
// kernel: lstm_forward.1
= control target key start
LH: loop header
LB: loop body
LE: loop exit
PB: predicated region body
PF: predicated region fallthrough
CT: control target
= control target key end

     0   :  { %10 = vsyncpa [#allocation4], 0  ;;  %s2559_s18 = smov [#allocation3]   ;;  %s3316_s0 = inlined_call_operand.vmem [shape: f32[64,2], index: 0, kind: input, shape index: {}]   ;;  %s3317_s1 = inlined_call_operand.vmem [shape: f32[4,512], index: 1, kind: input, shape index: {}]   ;;  %s3318_s2 = inlined_call_operand.hbm [shape: f32[128,512], index: 2, kind: input, shape index: {}]   ;;  %s3319_s3 = inlined_call_operand.vmem [shape: f32[16,128], index: 3, kind: input, shape index: {}]   ;;  %s3320_s4 = inlined_call_operand.vmem [shape: f32[128,128], index: 4, kind: input, shape index: {}]   ;;  %s3321_s5 = inlined_call_operand.vmem [shape: f32[8,384], index: 5, kind: output, shape index: {}]  }
   0x1   :  { %s20_s19 = sshll.u32 %s2559_s18, 4  ;;  %s2535_s22 = scalar_lea.hbm %s3318_s2, 8192  ;;  %s21_s19 = int_to_ptr.vmem [resolvable:$true] %s20_s19 }
   0x2   :  { %p2536_p0 = scmp.ne.s32.totalorder %s3318_s2, %s2535_s22  ;;  %p2539_p1 = scmp.lt.u32.totalorder %s2535_s22, %s3318_s2 }
   0x4   :  { %p2541_p2 = pnand %p2539_p1, %p2536_p0 }
   0x6   :  { %2544 = shalt.err (!%p2541_p2)
}
   0x7   :  { %s2545_s27 = scalar_lea.vmem %s21_s19, 8192  ;;  %p2550_p4 = scmp.lt.s32.totalorder %s21_s19, %s21_s19 }
   0x8   :  { %p2546_p3 = scmp.ne.s32.totalorder %s21_s19, %s2545_s27  ;;  %p2551_p5 = scmp.lt.s32.totalorder %s2545_s27, %s2545_s27 }
   0xa   :  { %p2552_p6 = por %p2551_p5, %p2550_p4 }
   0xc   :  { %p2553_p7 = pnand %p2552_p6, %p2546_p3 }
   0xe   :  { %2556 = shalt.err (!%p2553_p7)
}
   0xf   :  { %s2560_s28 = smov 512   ;;  %s2561_s29 = smov 32  }
  0x10   :  { %26 = dma.hbm_to_vmem [thread:$0]  %s3318_s2, 8192, %s21_s19, [#allocation4], %s2560_s28, %s2560_s28, %s2561_s29  }
  0x11   :  { %2557 = dma.done.wait [#allocation4], 8192  }
  0x12   :  { %2558 = vsyncadd [#allocation4], 4294959104  ;;  %v3322_v0 = vmov 0.0   ;;  %v2563_v1 = vmov 0   ;;  %v349_v2 = vld [vmem:[#allocation3 + $0x8] sm:$0xff]  ;;  %v351_v4 = vld [vmem:[#allocation3 + $0x18] sm:$0xff] }
  0x13   :  { %476 = vmatprep.mubr.f32.mxu0 %v3322_v0  ;;  %547 = vmatprep.mubr.f32.mxu1 %v3322_v0  ;;  %v353_v3 = vld [vmem:[#allocation3 + $0x28] sm:$0xff]  ;;  %v355_v6 = vld [vmem:[#allocation3 + $0x38] sm:$0xff]  ;;  %v348_v7 = vld [vmem:[#allocation3] sm:$0xff]  ;;  %vm2566_vm0 = vmmov 0  }
  0x14   :  { %2452 = vset.pattern.permute.xlu1 %v2563_v1  ;;  %2450 = vset.pattern.permute.xlu0 %v2563_v1  ;;  %v2613_v5 = vpack.c.bf16 %v353_v3, %v349_v2  ;;  %v352_v8 = vld [vmem:[#allocation3 + $0x20] sm:$0xff]  ;;  %v2615_v9 = vpack.c.bf16 %v355_v6, %v351_v4  ;;  %v350_v11 = vld [vmem:[#allocation3 + $0x10] sm:$0xff]  ;;  %v357_v13 = vld [vmem:[#allocation3 + $0x48] sm:$0xff] }
  0x15   :  { %v2617_v10 = vpack.c.bf16 %v352_v8, %v348_v7  ;;  %v354_v12 = vld [vmem:[#allocation3 + $0x30] sm:$0xff]  ;;  %v361_v15 = vld [vmem:[#allocation3 + $0x68] sm:$0xff]  ;;  %v359_v16 = vld [vmem:[#allocation3 + $0x58] sm:$0xff] }
  0x16   :  { %3334 = vst [vmem:[#allocation6_spill] sm:$0xff] %v2613_v5  ;;  %3335 = vst [vmem:[#allocation7_spill] sm:$0xff] %v2615_v9  ;;  %1907 = vmatprep.subr.bf16.mxu0 %v2613_v5  ;;  %v2620_v14 = vpack.c.bf16 %v354_v12, %v350_v11  ;;  %v363_v17 = vld [vmem:[#allocation3 + $0x78] sm:$0xff]  ;;  %1939 = vmatprep.subr.bf16.mxu1 %v2615_v9  ;;  %v2624_v18 = vpack.c.bf16 %v361_v15, %v357_v13  ;;  %v356_v20 = vld [vmem:[#allocation3 + $0x40] sm:$0xff] }
  0x17   :  { %1909 = vmatpush1.bf16.msra.mxu0 %v2617_v10  ;;  %v2626_v19 = vpack.c.bf16 %v363_v17, %v359_v16  ;;  %v360_v21 = vld [vmem:[#allocation3 + $0x60] sm:$0xff]  ;;  %v358_v22 = vld [vmem:[#allocation3 + $0x50] sm:$0xff]  ;;  %v365_v25 = vld [vmem:[#allocation3 + $0x88] sm:$0xff] }
  0x18   :  { %1941 = vmatpush1.bf16.msra.mxu1 %v2620_v14  ;;  %v2629_v23 = vpack.c.bf16 %v360_v21, %v356_v20  ;;  %v362_v24 = vld [vmem:[#allocation3 + $0x70] sm:$0xff]  ;;  %v369_v26 = vld [vmem:[#allocation3 + $0xa8] sm:$0xff]  ;;  %1911 = vmatprep.subr.bf16.mxu0 %v2624_v18  ;;  %v367_v29 = vld [vmem:[#allocation3 + $0x98] sm:$0xff] }
  0x19   :  { %1943 = vmatprep.subr.bf16.mxu1 %v2626_v19  ;;  %v2633_v27 = vpack.c.bf16 %v362_v24, %v358_v22  ;;  %v2635_v28 = vpack.c.bf16 %v369_v26, %v365_v25  ;;  %v371_v30 = vld [vmem:[#allocation3 + $0xb8] sm:$0xff]  ;;  %v364_v31 = vld [vmem:[#allocation3 + $0x80] sm:$0xff]  ;;  %v366_v34 = vld [vmem:[#allocation3 + $0x90] sm:$0xff] }
  0x1a   :  { %v2637_v32 = vpack.c.bf16 %v371_v30, %v367_v29  ;;  %v368_v33 = vld [vmem:[#allocation3 + $0xa0] sm:$0xff]  ;;  %v370_v35 = vld [vmem:[#allocation3 + $0xb0] sm:$0xff]  ;;  %v373_v37 = vld [vmem:[#allocation3 + $0xc8] sm:$0xff] }
  0x1b   :  { %1913 = vmatpush1.bf16.msra.mxu0 %v2629_v23  ;;  %v2640_v36 = vpack.c.bf16 %v368_v33, %v364_v31  ;;  %v377_v38 = vld [vmem:[#allocation3 + $0xe8] sm:$0xff]  ;;  %v375_v39 = vld [vmem:[#allocation3 + $0xd8] sm:$0xff]  ;;  %v2644_v40 = vpack.c.bf16 %v370_v35, %v366_v34  ;;  %v372_v43 = vld [vmem:[#allocation3 + $0xc0] sm:$0xff] }
  0x1c   :  { %1945 = vmatpush1.bf16.msra.mxu1 %v2633_v27  ;;  %1915 = vmatprep.subr.bf16.mxu0 %v2635_v28  ;;  %v2646_v41 = vpack.c.bf16 %v377_v38, %v373_v37  ;;  %v379_v42 = vld [vmem:[#allocation3 + $0xf8] sm:$0xff]  ;;  %v376_v44 = vld [vmem:[#allocation3 + $0xe0] sm:$0xff]  ;;  %v374_v46 = vld [vmem:[#allocation3 + $0xd0] sm:$0xff] }
  0x1d   :  { %1947 = vmatprep.subr.bf16.mxu1 %v2637_v32  ;;  %v2649_v45 = vpack.c.bf16 %v379_v42, %v375_v39  ;;  %v378_v47 = vld [vmem:[#allocation3 + $0xf0] sm:$0xff]  ;;  %v381_v48 = vld [vmem:[#allocation3 + $0x108] sm:$0xff]  ;;  %v383_v50 = vld [vmem:[#allocation3 + $0x118] sm:$0xff]  ;;  %v2652_v52 = vpack.c.bf16 %v376_v44, %v372_v43 }
  0x1e   :  { %v385_v49 = vld [vmem:[#allocation3 + $0x128] sm:$0xff]  ;;  %v387_v51 = vld [vmem:[#allocation3 + $0x138] sm:$0xff]  ;;  %v2656_v53 = vpack.c.bf16 %v378_v47, %v374_v46  ;;  %v380_v55 = vld [vmem:[#allocation3 + $0x100] sm:$0xff] }
  0x1f   :  { %1917 = vmatpush1.bf16.msra.mxu0 %v2640_v36  ;;  %v2658_v54 = vpack.c.bf16 %v385_v49, %v381_v48  ;;  %v384_v56 = vld [vmem:[#allocation3 + $0x120] sm:$0xff]  ;;  %v382_v57 = vld [vmem:[#allocation3 + $0x110] sm:$0xff]  ;;  %v2661_v58 = vpack.c.bf16 %v387_v51, %v383_v50  ;;  %v389_v60 = vld [vmem:[#allocation3 + $0x148] sm:$0xff]  ;;  %v2564_v50 = vmov 1  }
  0x20   :  { %1949 = vmatpush1.bf16.msra.mxu1 %v2644_v40  ;;  %1919 = vmatprep.subr.bf16.mxu0 %v2646_v41  ;;  %v386_v59 = vld [vmem:[#allocation3 + $0x130] sm:$0xff]  ;;  %v393_v61 = vld [vmem:[#allocation3 + $0x168] sm:$0xff]  ;;  %v391_v62 = vld [vmem:[#allocation3 + $0x158] sm:$0xff]  ;;  %v2664_v2 = vpack.c.bf16 %v384_v56, %v380_v55 }
  0x21   :  { %1951 = vmatprep.subr.bf16.mxu1 %v2649_v45  ;;  %v395_v63 = vld [vmem:[#allocation3 + $0x178] sm:$0xff]  ;;  %v2668_v3 = vpack.c.bf16 %v386_v59, %v382_v57  ;;  %v2670_v4 = vpack.c.bf16 %v393_v61, %v389_v60  ;;  %v388_v6 = vld [vmem:[#allocation3 + $0x140] sm:$0xff]  ;;  %v390_v8 = vld [vmem:[#allocation3 + $0x150] sm:$0xff] }
  0x22   :  { %v392_v7 = vld [vmem:[#allocation3 + $0x160] sm:$0xff]  ;;  %v2673_v11 = vpack.c.bf16 %v395_v63, %v391_v62  ;;  %v394_v12 = vld [vmem:[#allocation3 + $0x170] sm:$0xff]  ;;  %v397_v13 = vld [vmem:[#allocation3 + $0x188] sm:$0xff]  ;;  %v84_v63 = vlaneseq }
  0x23   :  { %1921 = vmatpush1.bf16.msra.mxu0 %v2652_v52  ;;  %v401_v15 = vld [vmem:[#allocation3 + $0x1a8] sm:$0xff]  ;;  %v399_v16 = vld [vmem:[#allocation3 + $0x198] sm:$0xff]  ;;  %v2676_v20 = vpack.c.bf16 %v392_v7, %v388_v6  ;;  %v396_v21 = vld [vmem:[#allocation3 + $0x180] sm:$0xff]  ;;  %v2680_v24 = vpack.c.bf16 %v394_v12, %v390_v8 }
  0x24   :  { %1953 = vmatpush1.bf16.msra.mxu1 %v2656_v53  ;;  %1923 = vmatprep.subr.bf16.mxu0 %v2658_v54  ;;  %v403_v17 = vld [vmem:[#allocation3 + $0x1b8] sm:$0xff]  ;;  %v400_v22 = vld [vmem:[#allocation3 + $0x1a0] sm:$0xff]  ;;  %v2682_v25 = vpack.c.bf16 %v401_v15, %v397_v13  ;;  %v398_v26 = vld [vmem:[#allocation3 + $0x190] sm:$0xff]  ;;  %v85_v6 = vshrl.u32 %v84_v63, 7 }
  0x25   :  { %1955 = vmatprep.subr.bf16.mxu1 %v2661_v58  ;;  %v402_v29 = vld [vmem:[#allocation3 + $0x1b0] sm:$0xff]  ;;  %v35_v30 = vld [vmem:[%s3316_s0 + $0x8] sm:$0xff]  ;;  %v2688_v31 = vpack.c.bf16 %v403_v17, %v399_v16  ;;  %v34_v35 = vld [vmem:[%s3316_s0] sm:$0xff]  ;;  %v2694_v39 = vpack.c.bf16 %v400_v22, %v396_v21 }
  0x26   :  { %v405_v33 = vld [vmem:[#allocation3 + $0x1c8] sm:$0xff]  ;;  %50 = vperm.xlu1 %2452, %v35_v30   ;;  %v407_v37 = vld [vmem:[#allocation3 + $0x1d8] sm:$0xff]  ;;  %45 = vperm.xlu0 %2450, %v34_v35   ;;  %v2698_v42 = vpack.c.bf16 %v402_v29, %v398_v26  ;;  %v404_v44 = vld [vmem:[#allocation3 + $0x1c0] sm:$0xff]  ;;  %v86_v7 = vsub.s32 0, %v85_v6  ;;  %v2789_v22 = vsub.s32 1, %v85_v6  ;;  %v2791_v26 = vsub.s32 2, %v85_v6 }
  0x27   :  { %1925 = vmatpush1.bf16.msra.mxu0 %v2664_v2  ;;  %v409_v34 = vld [vmem:[#allocation3 + $0x1e8] sm:$0xff]  ;;  %v411_v38 = vld [vmem:[#allocation3 + $0x1f8] sm:$0xff]  ;;  %v408_v46 = vld [vmem:[#allocation3 + $0x1e0] sm:$0xff]  ;;  %v2793_v29 = vsub.s32 3, %v85_v6 }
  0x28   :  { %1957 = vmatpush1.bf16.msra.mxu1 %v2668_v3  ;;  %1927 = vmatprep.subr.bf16.mxu0 %v2670_v4  ;;  %v2700_v43 = vpack.c.bf16 %v409_v34, %v405_v33  ;;  %v2703_v47 = vpack.c.bf16 %v411_v38, %v407_v37  ;;  %v406_v48 = vld [vmem:[#allocation3 + $0x1d0] sm:$0xff]  ;;  %v2706_v51 = vpack.c.bf16 %v408_v46, %v404_v44  ;;  %v342_v57 = vld [vmem:[%s3319_s3] sm:$0xff]  ;;  %v37_v59 = vld [vmem:[%s3316_s0 + $0x18] sm:$0xff] }
  0x29   :  { %1959 = vmatprep.subr.bf16.mxu1 %v2673_v11  ;;  %v410_v49 = vld [vmem:[#allocation3 + $0x1f0] sm:$0xff]  ;;  %v39_v60 = vld [vmem:[%s3316_s0 + $0x28] sm:$0xff]  ;;  %v41_v62 = vld [vmem:[%s3316_s0 + $0x38] sm:$0xff] }
  0x2a   :  { %2453 = vset.pattern.permute.xlu1 %v2564_v50  ;;  %2451 = vset.pattern.permute.xlu0 %v2564_v50  ;;  %v2710_v55 = vpack.c.bf16 %v410_v49, %v406_v48  ;;  %v36_v56 = vld [vmem:[%s3316_s0 + $0x10] sm:$0xff]  ;;  %v42_v8 = vld [vmem:[%s3317_s1] ss:$4 sm:$0xf] }
  0x2b   :  { %1929 = vmatpush1.bf16.msra.mxu0 %v2676_v20  ;;  %143 = vperm.xlu1 %2453, %v35_v30   ;;  %v40_v61 = vld [vmem:[%s3316_s0 + $0x30] sm:$0xff]  ;;  %v1851_v15 = vld [vmem:[%s3317_s1 + $0x1] ss:$4 sm:$0xf]  ;;  %v2783_v16 = vrot.slane %v42_v8, %v86_v7  ;;  %v2810_v44 = vrot.slane %v42_v8, %v2789_v22  ;;  %v2813_v46 = vrot.slane %v42_v8, %v2791_v26 }
  0x2c   :  { %1961 = vmatpush1.bf16.msra.mxu1 %v2680_v24  ;;  %1931 = vmatprep.subr.bf16.mxu0 %v2682_v25  ;;  %3336 = vst [vmem:[#allocation8_spill] sm:$0xff] %v2710_v55  ;;  %v2787_v21 = vrot.slane %v1851_v15, %v86_v7  ;;  %v2800_v33 = vld [vmem:[%s3317_s1 + $0x2] ss:$4 sm:$0xf]  ;;  %v2816_v48 = vrot.slane %v42_v8, %v2793_v29 }
  0x2d   :  { %1963 = vmatprep.subr.bf16.mxu1 %v2688_v31  ;;  %139 = vperm.xlu0 %2451, %v34_v35   ;;  %v2807_v37 = vrot.slane %v2800_v33, %v86_v7  ;;  %v2819_v49 = vrot.slane %v1851_v15, %v2789_v22  ;;  %v2822_v50 = vrot.slane %v1851_v15, %v2791_v26 }
  0x2f   :  { %1933 = vmatpush1.bf16.msra.mxu0 %v2694_v39  ;;  %2454 = vset.pattern.permute.xlu1 %v2563_v1  ;;  %v38_v1 = vld [vmem:[%s3316_s0 + $0x20] sm:$0xff] }
  0x30   :  { %1965 = vmatpush1.bf16.msra.mxu1 %v2698_v42  ;;  %1935 = vmatprep.subr.bf16.mxu0 %v2700_v43 }
  0x31   :  { %1967 = vmatprep.subr.bf16.mxu1 %v2703_v47  ;;  %55 = vperm.xlu1 %2454, %v36_v56  }
  0x32   :  { %147 = vperm.xlu0 %2451, %v36_v56   ;;  %v2825_v56 = vrot.slane %v1851_v15, %v2793_v29 }
  0x33   :  { %1937 = vmatpush1.bf16.msra.mxu0 %v2706_v51 }
  0x34   :  { %1969 = vmatpush1.bf16.msra.mxu1 %v2710_v55  ;;  %1971 = vmatprep.subr.bf16.mxu0 %v2613_v5 }
  0x35   :  { %2003 = vmatprep.subr.bf16.mxu1 %v2615_v9  ;;  %60 = vperm.xlu1 %2454, %v37_v59  }
  0x36   :  { %477 = vmatmul.mubr.f32.vlgmr.msra.gmra.mrb[0].mxu0 %v342_v57  ;;  %151 = vperm.xlu0 %2451, %v37_v59  }
  0x37   :  { %548 = vmatmul.mubr.f32.vlgmr.msra.gmra.mrb[0].mxu1 %v342_v57  ;;  %1973 = vmatpush1.bf16.msra.mxu0 %v2617_v10 }
  0x38   :  { %2005 = vmatpush1.bf16.msra.mxu1 %v2620_v14  ;;  %1975 = vmatprep.subr.bf16.mxu0 %v2624_v18 }
  0x39   :  { %2007 = vmatprep.subr.bf16.mxu1 %v2626_v19  ;;  %644 = vmatprep.mubr.f32.mxu0 %v3322_v0 }
  0x3a   :  { %65 = vperm.xlu1 %2454, %v38_v1   ;;  %715 = vmatprep.mubr.f32.mxu1 %v3322_v0 }
  0x3b   :  { %155 = vperm.xlu0 %2451, %v38_v1   ;;  %1977 = vmatpush1.bf16.msra.mxu0 %v2629_v23 }
  0x3c   :  { %2009 = vmatpush1.bf16.msra.mxu1 %v2633_v27  ;;  %1979 = vmatprep.subr.bf16.mxu0 %v2635_v28 }
  0x3d   :  { %2011 = vmatprep.subr.bf16.mxu1 %v2637_v32 }
  0x3e   :  { %70 = vperm.xlu1 %2454, %v39_v60  }
  0x3f   :  { %159 = vperm.xlu0 %2451, %v39_v60   ;;  %1981 = vmatpush1.bf16.msra.mxu0 %v2640_v36 }
  0x40   :  { %2013 = vmatpush1.bf16.msra.mxu1 %v2644_v40  ;;  %1983 = vmatprep.subr.bf16.mxu0 %v2646_v41 }
  0x41   :  { %2015 = vmatprep.subr.bf16.mxu1 %v2649_v45 }
  0x42   :  { %75 = vperm.xlu1 %2454, %v40_v61  }
  0x43   :  { %163 = vperm.xlu0 %2451, %v40_v61   ;;  %1985 = vmatpush1.bf16.msra.mxu0 %v2652_v52 }
  0x44   :  { %2017 = vmatpush1.bf16.msra.mxu1 %v2656_v53  ;;  %1987 = vmatprep.subr.bf16.mxu0 %v2658_v54 }
  0x45   :  { %2019 = vmatprep.subr.bf16.mxu1 %v2661_v58 }
  0x46   :  { %80 = vperm.xlu1 %2454, %v41_v62  }
  0x47   :  { %167 = vperm.xlu0 %2451, %v41_v62   ;;  %1989 = vmatpush1.bf16.msra.mxu0 %v2664_v2 }
  0x48   :  { %2021 = vmatpush1.bf16.msra.mxu1 %v2668_v3  ;;  %1991 = vmatprep.subr.bf16.mxu0 %v2670_v4 }
  0x49   :  { %2023 = vmatprep.subr.bf16.mxu1 %v2673_v11 }
  0x4b   :  { %1993 = vmatpush1.bf16.msra.mxu0 %v2676_v20 }
  0x4c   :  { %2025 = vmatpush1.bf16.msra.mxu1 %v2680_v24  ;;  %1995 = vmatprep.subr.bf16.mxu0 %v2682_v25 }
  0x4d   :  { %2027 = vmatprep.subr.bf16.mxu1 %v2688_v31 }
  0x4f   :  { %1997 = vmatpush1.bf16.msra.mxu0 %v2694_v39 }
  0x50   :  { %2029 = vmatpush1.bf16.msra.mxu1 %v2698_v42  ;;  %1999 = vmatprep.subr.bf16.mxu0 %v2700_v43 }
  0x51   :  { %2031 = vmatprep.subr.bf16.mxu1 %v2703_v47 }
  0x53   :  { %2001 = vmatpush1.bf16.msra.mxu0 %v2706_v51 }
  0x54   :  { %2033 = vmatpush1.bf16.msra.mxu1 %v2710_v55  ;;  %2035 = vmatprep.subr.bf16.mxu0 %v2613_v5 }
  0x55   :  { %2067 = vmatprep.subr.bf16.mxu1 %v2615_v9 }
  0xa5   :  { %v2776_v12 = vpop.permute.xlu1 %50  ;;  %v2778_v13 = vpop.permute.xlu0 %45 }
  0xa6   :  { %3337 = vst [vmem:[#allocation9_spill] sm:$0xff] %v2776_v12  ;;  %v108_v17 = vmul.f32 %v2783_v16, %v2776_v12 }
  0xaa   :  { %v2795_v30 = vpop.permute.xlu1 %143 }
  0xab   :  { %3338 = vst [vmem:[#allocation10_spill] sm:$0xff] %v2795_v30  ;;  %v195_v34 = vmul.f32 %v2787_v21, %v2795_v30 }
  0xac   :  { %v2804_v35 = vpop.permute.xlu0 %139 }
  0xad   :  { %v227_v38 = vadd.f32 %v195_v34, %v108_v17 }
  0xaf   :  { %v2828_v59 = vadd.f32 %v2807_v37, %v227_v38 }
  0xb0   :  { %v56_v57 = vpop.permute.xlu1 %55 }
  0xb1   :  { %3339 = vst [vmem:[#allocation11_spill] sm:$0xff] %v2828_v59  ;;  %v112_v1 = vmul.f32 %v2783_v16, %v56_v57  ;;  %v113_v60 = vmul.f32 %v2810_v44, %v56_v57  ;;  %v114_v61 = vmul.f32 %v2813_v46, %v56_v57  ;;  %v115_v62 = vmul.f32 %v2816_v48, %v56_v57  ;;  %v148_v63 = vpop.permute.xlu0 %147 }
  0xb2   :  { %v199_v6 = vmul.f32 %v2787_v21, %v148_v63  ;;  %v200_v7 = vmul.f32 %v2819_v49, %v148_v63  ;;  %v201_v8 = vmul.f32 %v2822_v50, %v148_v63  ;;  %v202_v15 = vmul.f32 %v2825_v56, %v148_v63 }
  0xb4   :  { %v61_v17 = vpop.permute.xlu1 %60  ;;  %v231_v34 = vadd.f32 %v199_v6, %v112_v1  ;;  %v2838_v38 = vadd.f32 %v201_v8, %v114_v61  ;;  %v2840_v0 = vadd.f32 %v200_v7, %v113_v60  ;;  %v2842_v59 = vadd.f32 %v202_v15, %v115_v62 }
  0xb5   :  { %v116_v30 = vmul.f32 %v2783_v16, %v61_v17  ;;  %v117_v57 = vmul.f32 %v2810_v44, %v61_v17  ;;  %v118_v12 = vmul.f32 %v2813_v46, %v61_v17  ;;  %v119_v9 = vmul.f32 %v2816_v48, %v61_v17  ;;  %v152_v5 = vpop.permute.xlu0 %151 }
  0xb6   :  { %3340 = vst [vmem:[#allocation12_spill] sm:$0xff] %v2838_v38  ;;  %3341 = vst [vmem:[#allocation13_spill] sm:$0xff] %v2840_v0  ;;  %v203_v55 = vmul.f32 %v2787_v21, %v152_v5  ;;  %v204_v63 = vmul.f32 %v2819_v49, %v152_v5  ;;  %v205_v1 = vmul.f32 %v2822_v50, %v152_v5 }
  0xb7   :  { %3342 = vst [vmem:[#allocation14_spill] sm:$0xff] %v2842_v59  ;;  %v206_v60 = vmul.f32 %v2825_v56, %v152_v5  ;;  %v2853_v61 = vadd.f32 %v2807_v37, %v231_v34 }
  0xb8   :  { %v235_v6 = vadd.f32 %v203_v55, %v116_v30  ;;  %v2855_v7 = vadd.f32 %v205_v1, %v118_v12  ;;  %v2857_v8 = vadd.f32 %v204_v63, %v117_v57 }
  0xb9   :  { %3343 = vst [vmem:[#allocation15_spill] sm:$0xff] %v2853_v61  ;;  %v66_v62 = vpop.permute.xlu1 %65  ;;  %v2859_v15 = vadd.f32 %v206_v60, %v119_v9 }
  0xba   :  { %3344 = vst [vmem:[#allocation16_spill] sm:$0xff] %v2855_v7  ;;  %3345 = vst [vmem:[#allocation17_spill] sm:$0xff] %v2857_v8  ;;  %v120_v17 = vmul.f32 %v2783_v16, %v66_v62  ;;  %v121_v59 = vmul.f32 %v2810_v44, %v66_v62  ;;  %v122_v0 = vmul.f32 %v2813_v46, %v66_v62  ;;  %v156_v5 = vpop.permute.xlu0 %155 }
  0xbb   :  { %3346 = vst [vmem:[#allocation18_spill] sm:$0xff] %v2859_v15  ;;  %v123_v38 = vmul.f32 %v2816_v48, %v66_v62  ;;  %v207_v34 = vmul.f32 %v2787_v21, %v156_v5  ;;  %v208_v61 = vmul.f32 %v2819_v49, %v156_v5  ;;  %v209_v55 = vmul.f32 %v2822_v50, %v156_v5 }
  0xbc   :  { %v210_v12 = vmul.f32 %v2825_v56, %v156_v5  ;;  %v2870_v9 = vadd.f32 %v2807_v37, %v235_v6 }
  0xbd   :  { %v71_v30 = vpop.permute.xlu1 %70  ;;  %v239_v57 = vadd.f32 %v207_v34, %v120_v17  ;;  %v2872_v63 = vadd.f32 %v209_v55, %v122_v0  ;;  %v2874_v1 = vadd.f32 %v208_v61, %v121_v59 }
  0xbe   :  { %3347 = vst [vmem:[#allocation19_spill] sm:$0xff] %v2870_v9  ;;  %v2876_v60 = vadd.f32 %v210_v12, %v123_v38  ;;  %v124_v62 = vmul.f32 %v2783_v16, %v71_v30  ;;  %v125_v15 = vmul.f32 %v2810_v44, %v71_v30  ;;  %v126_v8 = vmul.f32 %v2813_v46, %v71_v30  ;;  %v160_v5 = vpop.permute.xlu0 %159 }
  0xbf   :  { %3348 = vst [vmem:[#allocation20_spill] sm:$0xff] %v2872_v63  ;;  %3349 = vst [vmem:[#allocation21_spill] sm:$0xff] %v2874_v1  ;;  %v127_v7 = vmul.f32 %v2816_v48, %v71_v30  ;;  %v211_v6 = vmul.f32 %v2787_v21, %v160_v5  ;;  %v212_v9 = vmul.f32 %v2819_v49, %v160_v5 }
  0xc0   :  { %3350 = vst [vmem:[#allocation22_spill] sm:$0xff] %v2876_v60  ;;  %v213_v0 = vmul.f32 %v2822_v50, %v160_v5  ;;  %v214_v59 = vmul.f32 %v2825_v56, %v160_v5  ;;  %v2887_v38 = vadd.f32 %v2807_v37, %v239_v57 }
  0xc1   :  { %v76_v61 = vpop.permute.xlu1 %75  ;;  %v243_v17 = vadd.f32 %v211_v6, %v124_v62  ;;  %v2891_v55 = vadd.f32 %v212_v9, %v125_v15 }
  0xc2   :  { %3351 = vst [vmem:[#allocation23_spill] sm:$0xff] %v2887_v38  ;;  %v2889_v34 = vadd.f32 %v213_v0, %v126_v8  ;;  %v2893_v12 = vadd.f32 %v214_v59, %v127_v7  ;;  %v128_v30 = vmul.f32 %v2783_v16, %v76_v61  ;;  %v129_v60 = vmul.f32 %v2810_v44, %v76_v61  ;;  %v164_v5 = vpop.permute.xlu0 %163 }
  0xc3   :  { %3353 = vst [vmem:[#allocation25_spill] sm:$0xff] %v2891_v55  ;;  %v130_v1 = vmul.f32 %v2813_v46, %v76_v61  ;;  %v131_v63 = vmul.f32 %v2816_v48, %v76_v61  ;;  %v215_v57 = vmul.f32 %v2787_v21, %v164_v5  ;;  %v216_v38 = vmul.f32 %v2819_v49, %v164_v5 }
  0xc4   :  { %3352 = vst [vmem:[#allocation24_spill] sm:$0xff] %v2889_v34  ;;  %3354 = vst [vmem:[#allocation26_spill] sm:$0xff] %v2893_v12  ;;  %v217_v8 = vmul.f32 %v2822_v50, %v164_v5  ;;  %v218_v15 = vmul.f32 %v2825_v56, %v164_v5  ;;  %v2904_v7 = vadd.f32 %v2807_v37, %v243_v17 }
  0xc5   :  { %v81_v9 = vpop.permute.xlu1 %80  ;;  %v247_v62 = vadd.f32 %v215_v57, %v128_v30  ;;  %v2908_v0 = vadd.f32 %v216_v38, %v129_v60 }
  0xc6   :  { %3355 = vst [vmem:[#allocation27_spill] sm:$0xff] %v2904_v7  ;;  %v2906_v6 = vadd.f32 %v217_v8, %v130_v1  ;;  %v2910_v59 = vadd.f32 %v218_v15, %v131_v63  ;;  %v132_v61 = vmul.f32 %v2783_v16, %v81_v9  ;;  %v133_v12 = vmul.f32 %v2810_v44, %v81_v9  ;;  %v168_v5 = vpop.permute.xlu0 %167 }
  0xc7   :  { %v134_v55 = vmul.f32 %v2813_v46, %v81_v9  ;;  %v135_v34 = vmul.f32 %v2816_v48, %v81_v9  ;;  %v219_v17 = vmul.f32 %v2787_v21, %v168_v5  ;;  %v220_v7 = vmul.f32 %v2819_v49, %v168_v5 }
  0xc8   :  { %3356 = vst [vmem:[#allocation28_spill] sm:$0xff] %v2910_v59  ;;  %v221_v1 = vmul.f32 %v2822_v50, %v168_v5  ;;  %v222_v60 = vmul.f32 %v2825_v56, %v168_v5  ;;  %v2921_v63 = vadd.f32 %v2807_v37, %v247_v62  ;;  %v104_v9 = vmul.f32 %v2783_v16, %v2778_v13 }
  0xc9   :  { %v251_v38 = vadd.f32 %v219_v17, %v132_v61  ;;  %v2925_v57 = vadd.f32 %v220_v7, %v133_v12  ;;  %v191_v59 = vmul.f32 %v2787_v21, %v2804_v35  ;;  %v105_v62 = vmul.f32 %v2810_v44, %v2778_v13 }
  0xca   :  { %v2923_v30 = vadd.f32 %v221_v1, %v134_v55  ;;  %v2927_v8 = vadd.f32 %v222_v60, %v135_v34  ;;  %v192_v55 = vmul.f32 %v2819_v49, %v2804_v35  ;;  %v106_v12 = vmul.f32 %v2813_v46, %v2778_v13 }
  0xcb   :  { %3358 = vst [vmem:[#allocation30_spill] sm:$0xff] %v2925_v57  ;;  %v2930_v15 = vadd.f32 %v2807_v37, %v251_v38  ;;  %v193_v34 = vmul.f32 %v2822_v50, %v2804_v35  ;;  %v223_v7 = vadd.f32 %v191_v59, %v104_v9  ;;  %v2946_v16 = vrot.slane %v2800_v33, %v2789_v22 }
  0xcc   :  { %3357 = vst [vmem:[#allocation29_spill] sm:$0xff] %v2923_v30  ;;  %3359 = vst [vmem:[#allocation31_spill] sm:$0xff] %v2927_v8  ;;  %v224_v61 = vadd.f32 %v192_v55, %v105_v62  ;;  %v2950_v21 = vrot.slane %v2800_v33, %v2791_v26  ;;  %v107_v5 = vmul.f32 %v2816_v48, %v2778_v13 }
  0xcd   :  { %3360 = vst [vmem:[#allocation32_spill] sm:$0xff] %v2930_v15  ;;  %v194_v17 = vmul.f32 %v2825_v56, %v2804_v35  ;;  %v278_v1 = vadd.f32 %v2807_v37, %v223_v7  ;;  %v225_v60 = vadd.f32 %v193_v34, %v106_v12  ;;  %v2961_v13 = vrot.slane %v2800_v33, %v2793_v29  ;;  %v343_v29 = vld [vmem:[%s3319_s3 + $0x8] sm:$0xff] }
  0xce   :  { %v279_v59 = vadd.f32 %v2946_v16, %v224_v61 }
  0xcf   :  { %v280_v26 = vadd.f32 %v2950_v21, %v225_v60  ;;  %v226_v57 = vadd.f32 %v194_v17, %v107_v5 }
  0xd1   :  { %v281_v12 = vadd.f32 %v2961_v13, %v226_v57 }
 0x109   :  { %v478_v38 = vpop.f32.mrb[0].mxu0 }
 0x10a   :  { %v554_v9 = vadd.f32 %v478_v38, %v278_v1  ;;  %v549_v62 = vpop.f32.mrb[0].mxu1  ;;  %v480_v22 = vpop.f32.mrb[1].mxu0 }
 0x10b   :  { %v555_v55 = vadd.f32 %v480_v22, %v279_v59  ;;  %v551_v15 = vpop.f32.mrb[1].mxu1  ;;  %v556_v37 = vadd.f32 %v549_v62, %v280_v26  ;;  %v3361_v26 = vmov 0.0  }
 0x10c   :  { %v558_v8 = vmul.f32 0.5, %v554_v9  ;;  %v557_v34 = vadd.f32 %v551_v15, %v281_v12  ;;  %v3364_v12 = vld [vmem:[#allocation7_spill] sm:$0xff] }
 0x10d   :  { %v562_v35 = vmul.f32 0.5, %v555_v55 }
 0x10e   :  { %2455 = vtanh.f32 %v558_v8  ;;  %v567_v7 = vmul.f32 0.5, %v557_v34  ;;  %v3365_v34 = vld [vmem:[#allocation9_spill] sm:$0xff] }
 0x10f   :  { %2457 = vtanh.f32 %v562_v35  ;;  %v3362_v35 = vld [vmem:[#allocation8_spill] sm:$0xff] }
 0x110   :  { %2459 = vtanh.f32 %v556_v37  ;;  %v3363_v37 = vld [vmem:[#allocation6_spill] sm:$0xff] }
 0x111   :  { %2461 = vtanh.f32 %v567_v7  ;;  %v109_v7 = vmul.f32 %v2810_v44, %v3365_v34 }
 0x118   :  { %v2456_v61 = vpop.eup %2455 }
 0x119   :  { %v2458_v1 = vpop.eup %2457  ;;  %v560_v38 = vadd.f32 1.0, %v2456_v61  ;;  %v110_v61 = vmul.f32 %v2813_v46, %v3365_v34 }
 0x11a   :  { %v564_v59 = vadd.f32 1.0, %v2458_v1  ;;  %v2460_v33 = vpop.eup %2459  ;;  %v111_v1 = vmul.f32 %v2816_v48, %v3365_v34 }
 0x11b   :  { %v561_v60 = vmul.f32 0.5, %v560_v38  ;;  %v2462_v57 = vpop.eup %2461  ;;  %v3366_v38 = vld [vmem:[#allocation10_spill] sm:$0xff] }
 0x11c   :  { %v565_v5 = vmul.f32 0.5, %v564_v59  ;;  %v569_v15 = vadd.f32 1.0, %v2462_v57  ;;  %v196_v59 = vmul.f32 %v2819_v49, %v3366_v38 }
 0x11d   :  { %v572_v8 = vmul.f32 %v2460_v33, %v561_v60  ;;  %v197_v60 = vmul.f32 %v2822_v50, %v3366_v38 }
 0x11e   :  { %v571_v17 = vmul.f32 %v565_v5, %v343_v29  ;;  %v570_v62 = vmul.f32 0.5, %v569_v15  ;;  %v198_v29 = vmul.f32 %v2825_v56, %v3366_v38  ;;  %v228_v5 = vadd.f32 %v196_v59, %v109_v7  ;;  %v3367_v15 = vld [vmem:[#allocation11_spill] sm:$0xff] }
 0x11f   :  { %v229_v33 = vadd.f32 %v197_v60, %v110_v61 }
 0x120   :  { %v2967_v9 = vadd.f32 %v572_v8, %v571_v17  ;;  %v230_v8 = vadd.f32 %v198_v29, %v111_v1  ;;  %v283_v46 = vadd.f32 %v2946_v16, %v228_v5 }
 0x121   :  { %v284_v44 = vadd.f32 %v2950_v21, %v229_v33 }
 0x122   :  { %2463 = vtanh.f32 %v2967_v9  ;;  %v285_v48 = vadd.f32 %v2961_v13, %v230_v8 }
 0x12c   :  { %v2464_v22 = vpop.eup %2463 }
 0x12d   :  { %v575_v55 = vmul.f32 %v2464_v22, %v570_v62 }
 0x12f   :  { %645 = vmatmul.mubr.f32.vlgmr.msra.gmra.mrb[2].mxu0 %v575_v55  ;;  %716 = vmatmul.mubr.f32.vlgmr.msra.gmra.mrb[2].mxu1 %v575_v55 }
 0x130   :  { %2037 = vmatpush1.bf16.msra.mxu0 %v2617_v10  ;;  %2069 = vmatpush1.bf16.msra.mxu1 %v2620_v14 }
 0x131   :  { %2039 = vmatprep.subr.bf16.mxu0 %v2624_v18  ;;  %2071 = vmatprep.subr.bf16.mxu1 %v2626_v19 }
 0x132   :  { %812 = vmatprep.mubr.f32.mxu0 %v3361_v26  ;;  %883 = vmatprep.mubr.f32.mxu1 %v3361_v26 }
 0x134   :  { %2041 = vmatpush1.bf16.msra.mxu0 %v2629_v23  ;;  %2073 = vmatpush1.bf16.msra.mxu1 %v2633_v27 }
 0x135   :  { %2043 = vmatprep.subr.bf16.mxu0 %v2635_v28  ;;  %2075 = vmatprep.subr.bf16.mxu1 %v2637_v32 }
 0x138   :  { %2045 = vmatpush1.bf16.msra.mxu0 %v2640_v36  ;;  %2077 = vmatpush1.bf16.msra.mxu1 %v2644_v40 }
 0x139   :  { %2047 = vmatprep.subr.bf16.mxu0 %v2646_v41  ;;  %2079 = vmatprep.subr.bf16.mxu1 %v2649_v45 }
 0x13c   :  { %2049 = vmatpush1.bf16.msra.mxu0 %v2652_v52  ;;  %2081 = vmatpush1.bf16.msra.mxu1 %v2656_v53 }
 0x13d   :  { %2051 = vmatprep.subr.bf16.mxu0 %v2658_v54  ;;  %2083 = vmatprep.subr.bf16.mxu1 %v2661_v58 }
 0x140   :  { %2053 = vmatpush1.bf16.msra.mxu0 %v2664_v2  ;;  %2085 = vmatpush1.bf16.msra.mxu1 %v2668_v3 }
 0x141   :  { %2055 = vmatprep.subr.bf16.mxu0 %v2670_v4  ;;  %2087 = vmatprep.subr.bf16.mxu1 %v2673_v11 }
 0x144   :  { %2057 = vmatpush1.bf16.msra.mxu0 %v2676_v20  ;;  %2089 = vmatpush1.bf16.msra.mxu1 %v2680_v24 }
 0x145   :  { %2059 = vmatprep.subr.bf16.mxu0 %v2682_v25  ;;  %2091 = vmatprep.subr.bf16.mxu1 %v2688_v31 }
 0x148   :  { %2061 = vmatpush1.bf16.msra.mxu0 %v2694_v39  ;;  %2093 = vmatpush1.bf16.msra.mxu1 %v2698_v42 }
 0x149   :  { %2063 = vmatprep.subr.bf16.mxu0 %v2700_v43  ;;  %2095 = vmatprep.subr.bf16.mxu1 %v2703_v47 }
 0x14c   :  { %2065 = vmatpush1.bf16.msra.mxu0 %v2706_v51  ;;  %2097 = vmatpush1.bf16.msra.mxu1 %v3362_v35 }
 0x14d   :  { %2099 = vmatprep.subr.bf16.mxu0 %v3363_v37  ;;  %2131 = vmatprep.subr.bf16.mxu1 %v3364_v12 }
 0x202   :  { %v646_v17 = vpop.f32.mrb[2].mxu0  ;;  %v717_v57 = vpop.f32.mrb[2].mxu1 }
 0x203   :  { %v722_v62 = vadd.f32 %v646_v17, %v3367_v15  ;;  %v724_v49 = vadd.f32 %v717_v57, %v284_v44  ;;  %v648_v22 = vpop.f32.mrb[3].mxu0  ;;  %v719_v55 = vpop.f32.mrb[3].mxu1 }
 0x204   :  { %v723_v50 = vadd.f32 %v648_v22, %v283_v46  ;;  %v725_v34 = vadd.f32 %v719_v55, %v285_v48  ;;  %v3369_v22 = vld [vmem:[#allocation13_spill] sm:$0xff] }
 0x205   :  { %v726_v30 = vmul.f32 0.5, %v722_v62  ;;  %v287_v55 = vadd.f32 %v2946_v16, %v3369_v22 }
 0x206   :  { %v730_v56 = vmul.f32 0.5, %v723_v50  ;;  %v735_v7 = vmul.f32 0.5, %v725_v34  ;;  %v3370_v50 = vld [vmem:[#allocation14_spill] sm:$0xff] }
 0x207   :  { %2465 = vtanh.f32 %v726_v30  ;;  %v289_v34 = vadd.f32 %v2961_v13, %v3370_v50 }
 0x208   :  { %2467 = vtanh.f32 %v730_v56  ;;  %v3371_v56 = vld [vmem:[#allocation15_spill] sm:$0xff] }
 0x209   :  { %2469 = vtanh.f32 %v724_v49 }
 0x20a   :  { %2471 = vtanh.f32 %v735_v7 }
 0x211   :  { %v2466_v61 = vpop.eup %2465 }
 0x212   :  { %v2468_v1 = vpop.eup %2467  ;;  %v728_v38 = vadd.f32 1.0, %v2466_v61 }
 0x213   :  { %v732_v59 = vadd.f32 1.0, %v2468_v1  ;;  %v2470_v29 = vpop.eup %2469 }
 0x214   :  { %v729_v60 = vmul.f32 0.5, %v728_v38  ;;  %v2472_v17 = vpop.eup %2471 }
 0x215   :  { %v733_v33 = vmul.f32 0.5, %v732_v59  ;;  %v737_v30 = vadd.f32 1.0, %v2472_v17 }
 0x216   :  { %v740_v5 = vmul.f32 %v2470_v29, %v729_v60 }
 0x217   :  { %v739_v8 = vmul.f32 %v733_v33, %v2967_v9  ;;  %v738_v57 = vmul.f32 0.5, %v737_v30  ;;  %v3368_v9 = vld [vmem:[#allocation12_spill] sm:$0xff] }
 0x218   :  { %v288_v15 = vadd.f32 %v2950_v21, %v3368_v9 }
 0x219   :  { %v3021_v44 = vadd.f32 %v740_v5, %v739_v8 }
 0x21b   :  { %2473 = vtanh.f32 %v3021_v44 }
 0x225   :  { %v2474_v46 = vpop.eup %2473 }
 0x226   :  { %v743_v48 = vmul.f32 %v2474_v46, %v738_v57 }
 0x228   :  { %813 = vmatmul.mubr.f32.vlgmr.msra.gmra.mrb[4].mxu0 %v743_v48  ;;  %884 = vmatmul.mubr.f32.vlgmr.msra.gmra.mrb[4].mxu1 %v743_v48 }
 0x229   :  { %2101 = vmatpush1.bf16.msra.mxu0 %v2617_v10  ;;  %2133 = vmatpush1.bf16.msra.mxu1 %v2620_v14 }
 0x22a   :  { %2103 = vmatprep.subr.bf16.mxu0 %v2624_v18  ;;  %2135 = vmatprep.subr.bf16.mxu1 %v2626_v19 }
 0x22b   :  { %980 = vmatprep.mubr.f32.mxu0 %v3361_v26  ;;  %1051 = vmatprep.mubr.f32.mxu1 %v3361_v26 }
 0x22d   :  { %2105 = vmatpush1.bf16.msra.mxu0 %v2629_v23  ;;  %2137 = vmatpush1.bf16.msra.mxu1 %v2633_v27 }
 0x22e   :  { %2107 = vmatprep.subr.bf16.mxu0 %v2635_v28  ;;  %2139 = vmatprep.subr.bf16.mxu1 %v2637_v32 }
 0x231   :  { %2109 = vmatpush1.bf16.msra.mxu0 %v2640_v36  ;;  %2141 = vmatpush1.bf16.msra.mxu1 %v2644_v40 }
 0x232   :  { %2111 = vmatprep.subr.bf16.mxu0 %v2646_v41  ;;  %2143 = vmatprep.subr.bf16.mxu1 %v2649_v45 }
 0x235   :  { %2113 = vmatpush1.bf16.msra.mxu0 %v2652_v52  ;;  %2145 = vmatpush1.bf16.msra.mxu1 %v2656_v53 }
 0x236   :  { %2115 = vmatprep.subr.bf16.mxu0 %v2658_v54  ;;  %2147 = vmatprep.subr.bf16.mxu1 %v2661_v58 }
 0x239   :  { %2117 = vmatpush1.bf16.msra.mxu0 %v2664_v2  ;;  %2149 = vmatpush1.bf16.msra.mxu1 %v2668_v3 }
 0x23a   :  { %2119 = vmatprep.subr.bf16.mxu0 %v2670_v4  ;;  %2151 = vmatprep.subr.bf16.mxu1 %v2673_v11 }
 0x23d   :  { %2121 = vmatpush1.bf16.msra.mxu0 %v2676_v20  ;;  %2153 = vmatpush1.bf16.msra.mxu1 %v2680_v24 }
 0x23e   :  { %2123 = vmatprep.subr.bf16.mxu0 %v2682_v25  ;;  %2155 = vmatprep.subr.bf16.mxu1 %v2688_v31 }
 0x241   :  { %2125 = vmatpush1.bf16.msra.mxu0 %v2694_v39  ;;  %2157 = vmatpush1.bf16.msra.mxu1 %v2698_v42 }
 0x242   :  { %2127 = vmatprep.subr.bf16.mxu0 %v2700_v43  ;;  %2159 = vmatprep.subr.bf16.mxu1 %v2703_v47 }
 0x245   :  { %2129 = vmatpush1.bf16.msra.mxu0 %v2706_v51  ;;  %2161 = vmatpush1.bf16.msra.mxu1 %v3362_v35 }
 0x246   :  { %2163 = vmatprep.subr.bf16.mxu0 %v3363_v37  ;;  %2195 = vmatprep.subr.bf16.mxu1 %v3364_v12 }
 0x2fb   :  { %v814_v62 = vpop.f32.mrb[4].mxu0  ;;  %v885_v49 = vpop.f32.mrb[4].mxu1 }
 0x2fc   :  { %v890_v7 = vadd.f32 %v814_v62, %v3371_v56  ;;  %v892_v61 = vadd.f32 %v885_v49, %v288_v15  ;;  %v816_v1 = vpop.f32.mrb[5].mxu0  ;;  %v887_v38 = vpop.f32.mrb[5].mxu1 }
 0x2fd   :  { %v891_v59 = vadd.f32 %v816_v1, %v287_v55  ;;  %v893_v60 = vadd.f32 %v887_v38, %v289_v34  ;;  %v3373_v38 = vld [vmem:[#allocation17_spill] sm:$0xff] }
 0x2fe   :  { %v894_v29 = vmul.f32 0.5, %v890_v7 }
 0x2ff   :  { %v898_v33 = vmul.f32 0.5, %v891_v59  ;;  %v903_v5 = vmul.f32 0.5, %v893_v60  ;;  %v291_v59 = vadd.f32 %v2946_v16, %v3373_v38  ;;  %v3374_v60 = vld [vmem:[#allocation18_spill] sm:$0xff] }
 0x300   :  { %2475 = vtanh.f32 %v894_v29  ;;  %v293_v29 = vadd.f32 %v2961_v13, %v3374_v60 }
 0x301   :  { %2477 = vtanh.f32 %v898_v33  ;;  %v3375_v33 = vld [vmem:[#allocation19_spill] sm:$0xff] }
 0x302   :  { %2479 = vtanh.f32 %v892_v61 }
 0x303   :  { %2481 = vtanh.f32 %v903_v5 }
 0x30a   :  { %v2476_v8 = vpop.eup %2475 }
 0x30b   :  { %v2478_v17 = vpop.eup %2477  ;;  %v896_v30 = vadd.f32 1.0, %v2476_v8 }
 0x30c   :  { %v900_v57 = vadd.f32 1.0, %v2478_v17  ;;  %v2480_v48 = vpop.eup %2479 }
 0x30d   :  { %v897_v46 = vmul.f32 0.5, %v896_v30  ;;  %v2482_v22 = vpop.eup %2481 }
 0x30e   :  { %v901_v9 = vmul.f32 0.5, %v900_v57  ;;  %v905_v55 = vadd.f32 1.0, %v2482_v22 }
 0x30f   :  { %v908_v62 = vmul.f32 %v2480_v48, %v897_v46 }
 0x310   :  { %v907_v15 = vmul.f32 %v901_v9, %v3021_v44  ;;  %v906_v50 = vmul.f32 0.5, %v905_v55  ;;  %v3372_v44 = vld [vmem:[#allocation16_spill] sm:$0xff] }
 0x311   :  { %v292_v7 = vadd.f32 %v2950_v21, %v3372_v44 }
 0x312   :  { %v3066_v49 = vadd.f32 %v908_v62, %v907_v15 }
 0x314   :  { %2483 = vtanh.f32 %v3066_v49 }
 0x31e   :  { %v2484_v34 = vpop.eup %2483 }
 0x31f   :  { %v911_v56 = vmul.f32 %v2484_v34, %v906_v50 }
 0x321   :  { %981 = vmatmul.mubr.f32.vlgmr.msra.gmra.mrb[6].mxu0 %v911_v56  ;;  %1052 = vmatmul.mubr.f32.vlgmr.msra.gmra.mrb[6].mxu1 %v911_v56 }
 0x322   :  { %2165 = vmatpush1.bf16.msra.mxu0 %v2617_v10  ;;  %2197 = vmatpush1.bf16.msra.mxu1 %v2620_v14 }
 0x323   :  { %2167 = vmatprep.subr.bf16.mxu0 %v2624_v18  ;;  %2199 = vmatprep.subr.bf16.mxu1 %v2626_v19 }
 0x324   :  { %1148 = vmatprep.mubr.f32.mxu0 %v3361_v26  ;;  %1219 = vmatprep.mubr.f32.mxu1 %v3361_v26 }
 0x326   :  { %2169 = vmatpush1.bf16.msra.mxu0 %v2629_v23  ;;  %2201 = vmatpush1.bf16.msra.mxu1 %v2633_v27 }
 0x327   :  { %2171 = vmatprep.subr.bf16.mxu0 %v2635_v28  ;;  %2203 = vmatprep.subr.bf16.mxu1 %v2637_v32 }
 0x32a   :  { %2173 = vmatpush1.bf16.msra.mxu0 %v2640_v36  ;;  %2205 = vmatpush1.bf16.msra.mxu1 %v2644_v40 }
 0x32b   :  { %2175 = vmatprep.subr.bf16.mxu0 %v2646_v41  ;;  %2207 = vmatprep.subr.bf16.mxu1 %v2649_v45 }
 0x32e   :  { %2177 = vmatpush1.bf16.msra.mxu0 %v2652_v52  ;;  %2209 = vmatpush1.bf16.msra.mxu1 %v2656_v53 }
 0x32f   :  { %2179 = vmatprep.subr.bf16.mxu0 %v2658_v54  ;;  %2211 = vmatprep.subr.bf16.mxu1 %v2661_v58 }
 0x332   :  { %2181 = vmatpush1.bf16.msra.mxu0 %v2664_v2  ;;  %2213 = vmatpush1.bf16.msra.mxu1 %v2668_v3 }
 0x333   :  { %2183 = vmatprep.subr.bf16.mxu0 %v2670_v4  ;;  %2215 = vmatprep.subr.bf16.mxu1 %v2673_v11 }
 0x336   :  { %2185 = vmatpush1.bf16.msra.mxu0 %v2676_v20  ;;  %2217 = vmatpush1.bf16.msra.mxu1 %v2680_v24 }
 0x337   :  { %2187 = vmatprep.subr.bf16.mxu0 %v2682_v25  ;;  %2219 = vmatprep.subr.bf16.mxu1 %v2688_v31 }
 0x33a   :  { %2189 = vmatpush1.bf16.msra.mxu0 %v2694_v39  ;;  %2221 = vmatpush1.bf16.msra.mxu1 %v2698_v42 }
 0x33b   :  { %2191 = vmatprep.subr.bf16.mxu0 %v2700_v43  ;;  %2223 = vmatprep.subr.bf16.mxu1 %v2703_v47 }
 0x33e   :  { %2193 = vmatpush1.bf16.msra.mxu0 %v2706_v51  ;;  %2225 = vmatpush1.bf16.msra.mxu1 %v3362_v35 }
 0x33f   :  { %2227 = vmatprep.subr.bf16.mxu0 %v3363_v37  ;;  %2259 = vmatprep.subr.bf16.mxu1 %v3364_v12 }
 0x3f4   :  { %v982_v61 = vpop.f32.mrb[6].mxu0  ;;  %v1053_v1 = vpop.f32.mrb[6].mxu1 }
 0x3f5   :  { %v1058_v5 = vadd.f32 %v982_v61, %v3375_v33  ;;  %v1060_v8 = vadd.f32 %v1053_v1, %v292_v7  ;;  %v984_v17 = vpop.f32.mrb[7].mxu0  ;;  %v1055_v30 = vpop.f32.mrb[7].mxu1 }
 0x3f6   :  { %v1059_v57 = vadd.f32 %v984_v17, %v291_v59  ;;  %v1061_v46 = vadd.f32 %v1055_v30, %v293_v29  ;;  %v3377_v30 = vld [vmem:[#allocation21_spill] sm:$0xff] }
 0x3f7   :  { %v1062_v48 = vmul.f32 0.5, %v1058_v5 }
 0x3f8   :  { %v1066_v9 = vmul.f32 0.5, %v1059_v57  ;;  %v1071_v62 = vmul.f32 0.5, %v1061_v46  ;;  %v295_v57 = vadd.f32 %v2946_v16, %v3377_v30  ;;  %v3378_v46 = vld [vmem:[#allocation22_spill] sm:$0xff] }
 0x3f9   :  { %2485 = vtanh.f32 %v1062_v48  ;;  %v297_v48 = vadd.f32 %v2961_v13, %v3378_v46 }
 0x3fa   :  { %2487 = vtanh.f32 %v1066_v9  ;;  %v3379_v9 = vld [vmem:[#allocation23_spill] sm:$0xff] }
 0x3fb   :  { %2489 = vtanh.f32 %v1060_v8 }
 0x3fc   :  { %2491 = vtanh.f32 %v1071_v62 }
 0x403   :  { %v2486_v15 = vpop.eup %2485 }
 0x404   :  { %v2488_v22 = vpop.eup %2487  ;;  %v1064_v55 = vadd.f32 1.0, %v2486_v15 }
 0x405   :  { %v1068_v50 = vadd.f32 1.0, %v2488_v22  ;;  %v2490_v56 = vpop.eup %2489 }
 0x406   :  { %v1065_v34 = vmul.f32 0.5, %v1064_v55  ;;  %v2492_v38 = vpop.eup %2491 }
 0x407   :  { %v1069_v44 = vmul.f32 0.5, %v1068_v50  ;;  %v1073_v59 = vadd.f32 1.0, %v2492_v38 }
 0x408   :  { %v1076_v61 = vmul.f32 %v2490_v56, %v1065_v34 }
 0x409   :  { %v1075_v7 = vmul.f32 %v1069_v44, %v3066_v49  ;;  %v1074_v60 = vmul.f32 0.5, %v1073_v59  ;;  %v3376_v49 = vld [vmem:[#allocation20_spill] sm:$0xff] }
 0x40a   :  { %v296_v5 = vadd.f32 %v2950_v21, %v3376_v49 }
 0x40b   :  { %v3111_v1 = vadd.f32 %v1076_v61, %v1075_v7 }
 0x40d   :  { %2493 = vtanh.f32 %v3111_v1 }
 0x417   :  { %v2494_v29 = vpop.eup %2493 }
 0x418   :  { %v1079_v33 = vmul.f32 %v2494_v29, %v1074_v60 }
 0x41a   :  { %1149 = vmatmul.mubr.f32.vlgmr.msra.gmra.mrb[8].mxu0 %v1079_v33  ;;  %1220 = vmatmul.mubr.f32.vlgmr.msra.gmra.mrb[8].mxu1 %v1079_v33 }
 0x41b   :  { %2229 = vmatpush1.bf16.msra.mxu0 %v2617_v10  ;;  %2261 = vmatpush1.bf16.msra.mxu1 %v2620_v14 }
 0x41c   :  { %2231 = vmatprep.subr.bf16.mxu0 %v2624_v18  ;;  %2263 = vmatprep.subr.bf16.mxu1 %v2626_v19 }
 0x41d   :  { %1316 = vmatprep.mubr.f32.mxu0 %v3361_v26  ;;  %1387 = vmatprep.mubr.f32.mxu1 %v3361_v26 }
 0x41f   :  { %2233 = vmatpush1.bf16.msra.mxu0 %v2629_v23  ;;  %2265 = vmatpush1.bf16.msra.mxu1 %v2633_v27 }
 0x420   :  { %2235 = vmatprep.subr.bf16.mxu0 %v2635_v28  ;;  %2267 = vmatprep.subr.bf16.mxu1 %v2637_v32 }
 0x423   :  { %2237 = vmatpush1.bf16.msra.mxu0 %v2640_v36  ;;  %2269 = vmatpush1.bf16.msra.mxu1 %v2644_v40 }
 0x424   :  { %2239 = vmatprep.subr.bf16.mxu0 %v2646_v41  ;;  %2271 = vmatprep.subr.bf16.mxu1 %v2649_v45 }
 0x427   :  { %2241 = vmatpush1.bf16.msra.mxu0 %v2652_v52  ;;  %2273 = vmatpush1.bf16.msra.mxu1 %v2656_v53 }
 0x428   :  { %2243 = vmatprep.subr.bf16.mxu0 %v2658_v54  ;;  %2275 = vmatprep.subr.bf16.mxu1 %v2661_v58 }
 0x42b   :  { %2245 = vmatpush1.bf16.msra.mxu0 %v2664_v2  ;;  %2277 = vmatpush1.bf16.msra.mxu1 %v2668_v3 }
 0x42c   :  { %2247 = vmatprep.subr.bf16.mxu0 %v2670_v4  ;;  %2279 = vmatprep.subr.bf16.mxu1 %v2673_v11 }
 0x42f   :  { %2249 = vmatpush1.bf16.msra.mxu0 %v2676_v20  ;;  %2281 = vmatpush1.bf16.msra.mxu1 %v2680_v24 }
 0x430   :  { %2251 = vmatprep.subr.bf16.mxu0 %v2682_v25  ;;  %2283 = vmatprep.subr.bf16.mxu1 %v2688_v31 }
 0x433   :  { %2253 = vmatpush1.bf16.msra.mxu0 %v2694_v39  ;;  %2285 = vmatpush1.bf16.msra.mxu1 %v2698_v42 }
 0x434   :  { %2255 = vmatprep.subr.bf16.mxu0 %v2700_v43  ;;  %2287 = vmatprep.subr.bf16.mxu1 %v2703_v47 }
 0x437   :  { %2257 = vmatpush1.bf16.msra.mxu0 %v2706_v51  ;;  %2289 = vmatpush1.bf16.msra.mxu1 %v3362_v35 }
 0x438   :  { %2291 = vmatprep.subr.bf16.mxu0 %v3363_v37  ;;  %2323 = vmatprep.subr.bf16.mxu1 %v3364_v12 }
 0x4ed   :  { %v1150_v8 = vpop.f32.mrb[8].mxu0  ;;  %v1221_v17 = vpop.f32.mrb[8].mxu1 }
 0x4ee   :  { %v1226_v62 = vadd.f32 %v1150_v8, %v3379_v9  ;;  %v1228_v15 = vadd.f32 %v1221_v17, %v296_v5  ;;  %v1152_v22 = vpop.f32.mrb[9].mxu0  ;;  %v1223_v55 = vpop.f32.mrb[9].mxu1 }
 0x4ef   :  { %v1227_v50 = vadd.f32 %v1152_v22, %v295_v57  ;;  %v1229_v34 = vadd.f32 %v1223_v55, %v297_v48  ;;  %v3381_v55 = vld [vmem:[#allocation25_spill] sm:$0xff] }
 0x4f0   :  { %v1230_v56 = vmul.f32 0.5, %v1226_v62 }
 0x4f1   :  { %v1234_v44 = vmul.f32 0.5, %v1227_v50  ;;  %v1239_v61 = vmul.f32 0.5, %v1229_v34  ;;  %v299_v50 = vadd.f32 %v2946_v16, %v3381_v55  ;;  %v3382_v34 = vld [vmem:[#allocation26_spill] sm:$0xff] }
 0x4f2   :  { %2495 = vtanh.f32 %v1230_v56  ;;  %v301_v56 = vadd.f32 %v2961_v13, %v3382_v34 }
 0x4f3   :  { %2497 = vtanh.f32 %v1234_v44  ;;  %v3383_v44 = vld [vmem:[#allocation27_spill] sm:$0xff] }
 0x4f4   :  { %2499 = vtanh.f32 %v1228_v15 }
 0x4f5   :  { %2501 = vtanh.f32 %v1239_v61 }
 0x4fc   :  { %v2496_v7 = vpop.eup %2495 }
 0x4fd   :  { %v2498_v38 = vpop.eup %2497  ;;  %v1232_v59 = vadd.f32 1.0, %v2496_v7 }
 0x4fe   :  { %v1236_v60 = vadd.f32 1.0, %v2498_v38  ;;  %v2500_v33 = vpop.eup %2499 }
 0x4ff   :  { %v1233_v29 = vmul.f32 0.5, %v1232_v59  ;;  %v2502_v30 = vpop.eup %2501 }
 0x500   :  { %v1237_v49 = vmul.f32 0.5, %v1236_v60  ;;  %v1241_v57 = vadd.f32 1.0, %v2502_v30 }
 0x501   :  { %v1244_v8 = vmul.f32 %v2500_v33, %v1233_v29 }
 0x502   :  { %v1243_v5 = vmul.f32 %v1237_v49, %v3111_v1  ;;  %v1242_v46 = vmul.f32 0.5, %v1241_v57  ;;  %v3380_v1 = vld [vmem:[#allocation24_spill] sm:$0xff] }
 0x503   :  { %v300_v62 = vadd.f32 %v2950_v21, %v3380_v1 }
 0x504   :  { %v3156_v17 = vadd.f32 %v1244_v8, %v1243_v5 }
 0x506   :  { %2503 = vtanh.f32 %v3156_v17 }
 0x510   :  { %v2504_v48 = vpop.eup %2503 }
 0x511   :  { %v1247_v9 = vmul.f32 %v2504_v48, %v1242_v46 }
 0x513   :  { %1317 = vmatmul.mubr.f32.vlgmr.msra.gmra.mrb[10].mxu0 %v1247_v9  ;;  %1388 = vmatmul.mubr.f32.vlgmr.msra.gmra.mrb[10].mxu1 %v1247_v9 }
 0x514   :  { %2293 = vmatpush1.bf16.msra.mxu0 %v2617_v10  ;;  %2325 = vmatpush1.bf16.msra.mxu1 %v2620_v14 }
 0x515   :  { %2295 = vmatprep.subr.bf16.mxu0 %v2624_v18  ;;  %2327 = vmatprep.subr.bf16.mxu1 %v2626_v19 }
 0x516   :  { %1484 = vmatprep.mubr.f32.mxu0 %v3361_v26  ;;  %1555 = vmatprep.mubr.f32.mxu1 %v3361_v26 }
 0x518   :  { %2297 = vmatpush1.bf16.msra.mxu0 %v2629_v23  ;;  %2329 = vmatpush1.bf16.msra.mxu1 %v2633_v27 }
 0x519   :  { %2299 = vmatprep.subr.bf16.mxu0 %v2635_v28  ;;  %2331 = vmatprep.subr.bf16.mxu1 %v2637_v32 }
 0x51c   :  { %2301 = vmatpush1.bf16.msra.mxu0 %v2640_v36  ;;  %2333 = vmatpush1.bf16.msra.mxu1 %v2644_v40 }
 0x51d   :  { %2303 = vmatprep.subr.bf16.mxu0 %v2646_v41  ;;  %2335 = vmatprep.subr.bf16.mxu1 %v2649_v45 }
 0x520   :  { %2305 = vmatpush1.bf16.msra.mxu0 %v2652_v52  ;;  %2337 = vmatpush1.bf16.msra.mxu1 %v2656_v53 }
 0x521   :  { %2307 = vmatprep.subr.bf16.mxu0 %v2658_v54  ;;  %2339 = vmatprep.subr.bf16.mxu1 %v2661_v58 }
 0x524   :  { %2309 = vmatpush1.bf16.msra.mxu0 %v2664_v2  ;;  %2341 = vmatpush1.bf16.msra.mxu1 %v2668_v3 }
 0x525   :  { %2311 = vmatprep.subr.bf16.mxu0 %v2670_v4  ;;  %2343 = vmatprep.subr.bf16.mxu1 %v2673_v11 }
 0x528   :  { %2313 = vmatpush1.bf16.msra.mxu0 %v2676_v20  ;;  %2345 = vmatpush1.bf16.msra.mxu1 %v2680_v24 }
 0x529   :  { %2315 = vmatprep.subr.bf16.mxu0 %v2682_v25  ;;  %2347 = vmatprep.subr.bf16.mxu1 %v2688_v31 }
 0x52c   :  { %2317 = vmatpush1.bf16.msra.mxu0 %v2694_v39  ;;  %2349 = vmatpush1.bf16.msra.mxu1 %v2698_v42 }
 0x52d   :  { %2319 = vmatprep.subr.bf16.mxu0 %v2700_v43  ;;  %2351 = vmatprep.subr.bf16.mxu1 %v2703_v47 }
 0x530   :  { %2321 = vmatpush1.bf16.msra.mxu0 %v2706_v51  ;;  %2353 = vmatpush1.bf16.msra.mxu1 %v3362_v35 }
 0x531   :  { %2355 = vmatprep.subr.bf16.mxu0 %v3363_v37  ;;  %2387 = vmatprep.subr.bf16.mxu1 %v3364_v12 }
 0x5e6   :  { %v1318_v15 = vpop.f32.mrb[10].mxu0  ;;  %v1389_v22 = vpop.f32.mrb[10].mxu1 }
 0x5e7   :  { %v1394_v61 = vadd.f32 %v1318_v15, %v3383_v44  ;;  %v1396_v7 = vadd.f32 %v1389_v22, %v300_v62  ;;  %v1320_v38 = vpop.f32.mrb[11].mxu0  ;;  %v1391_v59 = vpop.f32.mrb[11].mxu1  ;;  %v1757_v44 = vld [vmem:[%s3320_s4 + $0x18] sm:$0xff] }
 0x5e8   :  { %v1395_v60 = vadd.f32 %v1320_v38, %v299_v50  ;;  %v1397_v37 = vadd.f32 %v1391_v59, %v301_v56  ;;  %v1756_v56 = vld [vmem:[%s3320_s4 + $0x10] sm:$0xff]  ;;  %v1759_v38 = vld [vmem:[%s3320_s4 + $0x28] sm:$0xff] }
 0x5e9   :  { %v1398_v29 = vmul.f32 0.5, %v1394_v61  ;;  %v2422_v61 = vpack.c.bf16 %v1757_v44, %v1756_v56 }
 0x5ea   :  { %v1402_v12 = vmul.f32 0.5, %v1395_v60  ;;  %v1407_v33 = vmul.f32 0.5, %v1397_v37  ;;  %v1760_v60 = vld [vmem:[%s3320_s4 + $0x30] sm:$0xff]  ;;  %v1761_v37 = vld [vmem:[%s3320_s4 + $0x38] sm:$0xff] }
 0x5eb   :  { %2505 = vtanh.f32 %v1398_v29  ;;  %v2428_v29 = vpack.c.bf16 %v1761_v37, %v1760_v60 }
 0x5ec   :  { %2507 = vtanh.f32 %v1402_v12  ;;  %v1762_v12 = vld [vmem:[%s3320_s4 + $0x40] sm:$0xff] }
 0x5ed   :  { %2509 = vtanh.f32 %v1396_v7  ;;  %v1758_v7 = vld [vmem:[%s3320_s4 + $0x20] sm:$0xff] }
 0x5ee   :  { %2511 = vtanh.f32 %v1407_v33  ;;  %v2425_v59 = vpack.c.bf16 %v1759_v38, %v1758_v7  ;;  %v1763_v33 = vld [vmem:[%s3320_s4 + $0x48] sm:$0xff] }
 0x5f5   :  { %v2506_v49 = vpop.eup %2505 }
 0x5f6   :  { %v2508_v8 = vpop.eup %2507  ;;  %v1400_v5 = vadd.f32 1.0, %v2506_v49  ;;  %v2431_v49 = vpack.c.bf16 %v1763_v33, %v1762_v12 }
 0x5f7   :  { %v1404_v30 = vadd.f32 1.0, %v2508_v8  ;;  %v2510_v46 = vpop.eup %2509  ;;  %v1764_v8 = vld [vmem:[%s3320_s4 + $0x50] sm:$0xff] }
 0x5f8   :  { %v1401_v57 = vmul.f32 0.5, %v1400_v5  ;;  %v2512_v15 = vpop.eup %2511  ;;  %v1765_v5 = vld [vmem:[%s3320_s4 + $0x58] sm:$0xff] }
 0x5f9   :  { %v1405_v48 = vmul.f32 0.5, %v1404_v30  ;;  %v1409_v22 = vadd.f32 1.0, %v2512_v15  ;;  %v2434_v30 = vpack.c.bf16 %v1765_v5, %v1764_v8  ;;  %v3385_v15 = vld [vmem:[#allocation29_spill] sm:$0xff] }
 0x5fa   :  { %v1412_v9 = vmul.f32 %v2510_v46, %v1401_v57  ;;  %v1766_v57 = vld [vmem:[%s3320_s4 + $0x60] sm:$0xff]  ;;  %v1767_v46 = vld [vmem:[%s3320_s4 + $0x68] sm:$0xff] }
 0x5fb   :  { %v1411_v1 = vmul.f32 %v1405_v48, %v3156_v17  ;;  %v1410_v55 = vmul.f32 0.5, %v1409_v22  ;;  %v2565_v17 = vmov 0.0|0.0   ;;  %v2437_v48 = vpack.c.bf16 %v1767_v46, %v1766_v57 }
 0x5fc   :  { %v308_v22 = vadd.f32 %v2950_v21, %v3385_v15 }
 0x5fd   :  { %v3201_v62 = vadd.f32 %v1412_v9, %v1411_v1  ;;  %v1768_v9 = vld [vmem:[%s3320_s4 + $0x70] sm:$0xff]  ;;  %v1769_v1 = vld [vmem:[%s3320_s4 + $0x78] sm:$0xff] }
 0x5ff   :  { %2513 = vtanh.f32 %v3201_v62 }
 0x609   :  { %v2514_v50 = vpop.eup %2513 }
 0x60a   :  { %v1415_v34 = vmul.f32 %v2514_v50, %v1410_v55 }
 0x60c   :  { %1485 = vmatmul.mubr.f32.vlgmr.msra.gmra.mrb[12].mxu0 %v1415_v34  ;;  %1556 = vmatmul.mubr.f32.vlgmr.msra.gmra.mrb[12].mxu1 %v1415_v34  ;;  %v3386_v34 = vld [vmem:[#allocation30_spill] sm:$0xff] }
 0x60d   :  { %2357 = vmatpush1.bf16.msra.mxu0 %v2617_v10  ;;  %2389 = vmatpush1.bf16.msra.mxu1 %v2620_v14  ;;  %v304_v10 = vadd.f32 %v2950_v21, %v2906_v6 }
 0x60e   :  { %2359 = vmatprep.subr.bf16.mxu0 %v2624_v18  ;;  %2391 = vmatprep.subr.bf16.mxu1 %v2626_v19  ;;  %v303_v19 = vadd.f32 %v2946_v16, %v2908_v0  ;;  %v1754_v0 = vld [vmem:[%s3320_s4] sm:$0xff] }
 0x60f   :  { %1652 = vmatprep.mubr.f32.mxu0 %v3361_v26  ;;  %1723 = vmatprep.mubr.f32.mxu1 %v3361_v26 }
 0x611   :  { %2361 = vmatpush1.bf16.msra.mxu0 %v2629_v23  ;;  %2393 = vmatpush1.bf16.msra.mxu1 %v2633_v27  ;;  %v3384_v23 = vld [vmem:[#allocation28_spill] sm:$0xff] }
 0x612   :  { %2363 = vmatprep.subr.bf16.mxu0 %v2635_v28  ;;  %2395 = vmatprep.subr.bf16.mxu1 %v2637_v32  ;;  %v305_v27 = vadd.f32 %v2961_v13, %v3384_v23 }
 0x615   :  { %2365 = vmatpush1.bf16.msra.mxu0 %v2640_v36  ;;  %2397 = vmatpush1.bf16.msra.mxu1 %v2644_v40 }
 0x616   :  { %2367 = vmatprep.subr.bf16.mxu0 %v2646_v41  ;;  %2399 = vmatprep.subr.bf16.mxu1 %v2649_v45 }
 0x619   :  { %2369 = vmatpush1.bf16.msra.mxu0 %v2652_v52  ;;  %2401 = vmatpush1.bf16.msra.mxu1 %v2656_v53 }
 0x61a   :  { %2371 = vmatprep.subr.bf16.mxu0 %v2658_v54  ;;  %2403 = vmatprep.subr.bf16.mxu1 %v2661_v58 }
 0x61d   :  { %2373 = vmatpush1.bf16.msra.mxu0 %v2664_v2  ;;  %2405 = vmatpush1.bf16.msra.mxu1 %v2668_v3 }
 0x61e   :  { %2375 = vmatprep.subr.bf16.mxu0 %v2670_v4  ;;  %2407 = vmatprep.subr.bf16.mxu1 %v2673_v11 }
 0x621   :  { %2377 = vmatpush1.bf16.msra.mxu0 %v2676_v20  ;;  %2409 = vmatpush1.bf16.msra.mxu1 %v2680_v24 }
 0x622   :  { %2379 = vmatprep.subr.bf16.mxu0 %v2682_v25  ;;  %2411 = vmatprep.subr.bf16.mxu1 %v2688_v31 }
 0x625   :  { %2381 = vmatpush1.bf16.msra.mxu0 %v2694_v39  ;;  %2413 = vmatpush1.bf16.msra.mxu1 %v2698_v42 }
 0x626   :  { %2383 = vmatprep.subr.bf16.mxu0 %v2700_v43  ;;  %2415 = vmatprep.subr.bf16.mxu1 %v2703_v47 }
 0x629   :  { %2385 = vmatpush1.bf16.msra.mxu0 %v2706_v51  ;;  %2417 = vmatpush1.bf16.msra.mxu1 %v3362_v35 }
 0x62a   :  { %2418 = vmatprep.subr.bf16.mxu0 %v2565_v17 }
 0x6df   :  { %v1486_v14 = vpop.f32.mrb[12].mxu0  ;;  %v1557_v18 = vpop.f32.mrb[12].mxu1 }
 0x6e0   :  { %v1562_v28 = vadd.f32 %v1486_v14, %v2921_v63  ;;  %v1564_v32 = vadd.f32 %v1557_v18, %v304_v10  ;;  %v1488_v36 = vpop.f32.mrb[13].mxu0  ;;  %v1559_v40 = vpop.f32.mrb[13].mxu1  ;;  %v1755_v63 = vld [vmem:[%s3320_s4 + $0x8] sm:$0xff]  ;;  %v307_v10 = vadd.f32 %v2946_v16, %v3386_v34 }
 0x6e1   :  { %v1563_v41 = vadd.f32 %v1488_v36, %v303_v19  ;;  %v1565_v45 = vadd.f32 %v1559_v40, %v305_v27  ;;  %v2419_v35 = vpack.c.bf16 %v1755_v63, %v1754_v0  ;;  %v3387_v14 = vld [vmem:[#allocation31_spill] sm:$0xff]  ;;  %v3388_v19 = vld [vmem:[#allocation32_spill] sm:$0xff] }
 0x6e2   :  { %v1566_v52 = vmul.f32 0.5, %v1562_v28  ;;  %v309_v18 = vadd.f32 %v2961_v13, %v3387_v14 }
 0x6e3   :  { %v1570_v53 = vmul.f32 0.5, %v1563_v41  ;;  %v1575_v54 = vmul.f32 0.5, %v1565_v45 }
 0x6e4   :  { %2515 = vtanh.f32 %v1566_v52 }
 0x6e5   :  { %2517 = vtanh.f32 %v1570_v53 }
 0x6e6   :  { %2519 = vtanh.f32 %v1564_v32 }
 0x6e7   :  { %2521 = vtanh.f32 %v1575_v54 }
 0x6ee   :  { %v2516_v58 = vpop.eup %2515 }
 0x6ef   :  { %v2518_v2 = vpop.eup %2517  ;;  %v1568_v3 = vadd.f32 1.0, %v2516_v58 }
 0x6f0   :  { %v1572_v4 = vadd.f32 1.0, %v2518_v2  ;;  %v2520_v20 = vpop.eup %2519 }
 0x6f1   :  { %v1569_v11 = vmul.f32 0.5, %v1568_v3  ;;  %v2522_v42 = vpop.eup %2521 }
 0x6f2   :  { %v1573_v24 = vmul.f32 0.5, %v1572_v4  ;;  %v1577_v43 = vadd.f32 1.0, %v2522_v42 }
 0x6f3   :  { %v1580_v25 = vmul.f32 %v2520_v20, %v1569_v11 }
 0x6f4   :  { %v1579_v31 = vmul.f32 %v1573_v24, %v3201_v62  ;;  %v1578_v47 = vmul.f32 0.5, %v1577_v43  ;;  %v2440_v62 = vpack.c.bf16 %v1769_v1, %v1768_v9 }
 0x6f6   :  { %v3244_v39 = vadd.f32 %v1580_v25, %v1579_v31 }
 0x6f8   :  { %2523 = vtanh.f32 %v3244_v39 }
 0x702   :  { %v2524_v51 = vpop.eup %2523 }
 0x703   :  { %v1583_v6 = vmul.f32 %v2524_v51, %v1578_v47 }
 0x705   :  { %1653 = vmatmul.mubr.f32.vlgmr.msra.gmra.mrb[14].mxu0 %v1583_v6  ;;  %1724 = vmatmul.mubr.f32.vlgmr.msra.gmra.mrb[14].mxu1 %v1583_v6 }
 0x706   :  { %2420 = vmatpush3.bf16.msra.mxu0 %v2419_v35  ;;  %1903 = vmatprep.mubr.msk.f32.mxu0 %vm2566_vm0, %v3361_v26 }
 0x707   :  { %2421 = vmatprep.subr.bf16.mxu0 %v2565_v17 }
 0x70a   :  { %2423 = vmatpush3.bf16.msra.mxu0 %v2422_v61 }
 0x70b   :  { %2424 = vmatprep.subr.bf16.mxu0 %v2565_v17 }
 0x70e   :  { %2426 = vmatpush3.bf16.msra.mxu0 %v2425_v59 }
 0x70f   :  { %2427 = vmatprep.subr.bf16.mxu0 %v2565_v17 }
 0x712   :  { %2429 = vmatpush3.bf16.msra.mxu0 %v2428_v29 }
 0x713   :  { %2430 = vmatprep.subr.bf16.mxu0 %v2565_v17 }
 0x716   :  { %2432 = vmatpush3.bf16.msra.mxu0 %v2431_v49 }
 0x717   :  { %2433 = vmatprep.subr.bf16.mxu0 %v2565_v17 }
 0x71a   :  { %2435 = vmatpush3.bf16.msra.mxu0 %v2434_v30 }
 0x71b   :  { %2436 = vmatprep.subr.bf16.mxu0 %v2565_v17 }
 0x71e   :  { %2438 = vmatpush3.bf16.msra.mxu0 %v2437_v48 }
 0x71f   :  { %2439 = vmatprep.subr.bf16.mxu0 %v2565_v17 }
 0x722   :  { %2441 = vmatpush3.bf16.msra.mxu0 %v2440_v62 }
 0x7d8   :  { %v1654_v55 = vpop.f32.mrb[14].mxu0  ;;  %v1725_v50 = vpop.f32.mrb[14].mxu1 }
 0x7d9   :  { %v1730_v23 = vadd.f32 %v1654_v55, %v3388_v19  ;;  %v1732_v27 = vadd.f32 %v1725_v50, %v308_v22  ;;  %v1656_v28 = vpop.f32.mrb[15].mxu0  ;;  %v1727_v32 = vpop.f32.mrb[15].mxu1 }
 0x7da   :  { %v1731_v36 = vadd.f32 %v1656_v28, %v307_v10  ;;  %v1733_v40 = vadd.f32 %v1727_v32, %v309_v18 }
 0x7db   :  { %v1734_v41 = vmul.f32 0.5, %v1730_v23 }
 0x7dc   :  { %v1738_v26 = vmul.f32 0.5, %v1731_v36  ;;  %v1743_v21 = vmul.f32 0.5, %v1733_v40 }
 0x7dd   :  { %2525 = vtanh.f32 %v1734_v41 }
 0x7de   :  { %2527 = vtanh.f32 %v1738_v26 }
 0x7df   :  { %2529 = vtanh.f32 %v1732_v27 }
 0x7e0   :  { %2531 = vtanh.f32 %v1743_v21 }
 0x7e7   :  { %v2526_v45 = vpop.eup %2525 }
 0x7e8   :  { %v2528_v52 = vpop.eup %2527  ;;  %v1736_v53 = vadd.f32 1.0, %v2526_v45 }
 0x7e9   :  { %v1740_v16 = vadd.f32 1.0, %v2528_v52  ;;  %v2530_v13 = vpop.eup %2529 }
 0x7ea   :  { %v1737_v54 = vmul.f32 0.5, %v1736_v53  ;;  %v2532_v11 = vpop.eup %2531 }
 0x7eb   :  { %v1741_v58 = vmul.f32 0.5, %v1740_v16  ;;  %v1745_v20 = vadd.f32 1.0, %v2532_v11 }
 0x7ec   :  { %v1748_v2 = vmul.f32 %v2530_v13, %v1737_v54 }
 0x7ed   :  { %v1747_v3 = vmul.f32 %v1741_v58, %v3244_v39  ;;  %v1746_v24 = vmul.f32 0.5, %v1745_v20  ;;  %v1853_v39 = vld [vmem:[%s3317_s1 + $0x3] ss:$0 sm:$0xff] }
 0x7ef   :  { %v1749_v4 = vadd.f32 %v1748_v2, %v1747_v3 }
 0x7f1   :  { %2533 = vtanh.f32 %v1749_v4  ;;  %1753 = vst [vmem:[%s3321_s5 + $0x8] sm:$0xff] %v1749_v4 }
 0x7fb   :  { %v2534_v25 = vpop.eup %2533 }
 0x7fc   :  { %v1751_v31 = vmul.f32 %v2534_v25, %v1746_v24 }
 0x7fe   :  { %1752 = vst [vmem:[%s3321_s5] sm:$0xff] %v1751_v31  ;;  %1904 = vmatmul.mubr.f32.vlgmr.msra.gmra.mrb[16].mxu0 %v1751_v31 }
 0x8d1   :  { %v1841_v42 = vpop.f32.mrb[16].mxu0 }
 0x8d2   :  { %v1842_v43 = vadd.f32 %v1853_v39, %v1841_v42  ;;  %v1905_v47 = vpop.f32.mrb[17].mxu0 }
 0x8d4   :  { %1845 = vst [vmem:[%s3321_s5 + $0x10] sm:$0xff] %v1842_v43 }
 0x8d5   :  { %1850 = vsyncpa [#allocation4], 1 }

</bundles_post_ra>
